<compile_context>
chip_gen: v6e
topology: v6e:2x2x1
jax: 0.10.0
libtpu: 0.0.40
codegen_flags: <defaults>
</compile_context>

<pallas_src>
import jax
import jax.numpy as jnp
from jax import lax
from jax.experimental import pallas as pl
from jax.experimental.pallas import tpu as pltpu


# --------------------------------- helpers -----------------------------------
def _round_up(x, m):
    return (x + m - 1) // m * m


def _pad2(a, rows, cols):
    return jnp.pad(a, ((0, rows - a.shape[0]), (0, cols - a.shape[1])))


# --------------------------- row-tiled linear kernel --------------------------
def linear_kernel(x_ref, w_ref, b_ref, o_ref):
    x = x_ref[...].astype(jnp.bfloat16)                    # bf16 MXU input
    acc = jnp.dot(x, w_ref[...], preferred_element_type=jnp.float32)
    o_ref[...] = (acc + b_ref[...]).astype(o_ref.dtype)


def pallas_linear(x, w_bf16, b_row, *, nt_target=256):
    """x: (N, K) f32, w: (K, M) bf16, b: (1, M) f32 -> (N, M) f32. Row-tiled."""
    N, K = x.shape
    M = w_bf16.shape[1]
    nt = nt_target if N >= nt_target else _round_up(N, 8)
    n_pad = _round_up(N, nt)
    if n_pad != N:
        x = jnp.pad(x, ((0, n_pad - N), (0, 0)))
    out = pl.pallas_call(
        linear_kernel,
        out_shape=jax.ShapeDtypeStruct((n_pad, M), jnp.float32),
        grid_spec=pltpu.PrefetchScalarGridSpec(
            num_scalar_prefetch=0,
            grid=(n_pad // nt,),
            in_specs=[pl.BlockSpec((nt, K), lambda i: (i, 0)),
                      pl.BlockSpec((K, M), lambda i: (0, 0)),
                      pl.BlockSpec((1, M), lambda i: (0, 0))],
            out_specs=pl.BlockSpec((nt, M), lambda i: (i, 0)),
        ),
        compiler_params=pltpu.CompilerParams(
            dimension_semantics=("parallel",)),
    )(x, w_bf16, b_row)
    return out[:N]


# ------------------------- GRU recurrence (time chunks) -----------------------
def gru_chunk_kernel(gi_ref, whh_ref, bhh_ref, out_ref, h_scr):
    """One grid step = Tc timesteps. h carried in VMEM scratch across chunks.
    gi_ref already contains x @ W_ih^T + b_ih (hoisted out of the recurrence)."""
    c = pl.program_id(0)

    @pl.when(c == 0)
    def _():
        h_scr[...] = jnp.zeros_like(h_scr)

    Hp = h_scr.shape[1]
    Tc = gi_ref.shape[0]
    whh = whh_ref[...]                           # (Hp, 3Hp) bf16, loop-invariant
    bhh = bhh_ref[...]                           # (1, 3Hp)  f32

    def step(t, h):
        gi = gi_ref[t]                                              # (Bp, 3Hp) f32
        gh = jnp.dot(h.astype(jnp.bfloat16), whh,
                     preferred_element_type=jnp.float32) + bhh      # fused 3-gate matmul
        # gate order follows PyTorch: r, z, n (lane-aligned static slices)
        r = jax.nn.sigmoid(gi[:, 0:Hp] + gh[:, 0:Hp])
        z = jax.nn.sigmoid(gi[:, Hp:2 * Hp] + gh[:, Hp:2 * Hp])
        n = jnp.tanh(gi[:, 2 * Hp:] + r * gh[:, 2 * Hp:])
        h_new = (1.0 - z) * n + z * h                               # f32 state
        out_ref[t] = h_new.astype(out_ref.dtype)
        return h_new

    h_scr[...] = lax.fori_loop(0, Tc, step, h_scr[...], unroll=True)


def gru_recurrence(gi_tm, whh_t, bhh, Hp, Tc):
    """gi_tm: (Tp, Bp, 3Hp) f32; whh_t: (Hp, 3Hp) bf16; bhh: (1, 3Hp) f32."""
    Tp, Bp, G = gi_tm.shape
    return pl.pallas_call(
        gru_chunk_kernel,
        out_shape=jax.ShapeDtypeStruct((Tp, Bp, Hp), jnp.float32),
        grid_spec=pltpu.PrefetchScalarGridSpec(
            num_scalar_prefetch=0,
            grid=(Tp // Tc,),
            in_specs=[pl.BlockSpec((Tc, Bp, G), lambda c: (c, 0, 0)),
                      pl.BlockSpec((Hp, G), lambda c: (0, 0)),
                      pl.BlockSpec((1, G), lambda c: (0, 0))],
            out_specs=pl.BlockSpec((Tc, Bp, Hp), lambda c: (c, 0, 0)),
            scratch_shapes=[pltpu.VMEM((Bp, Hp), jnp.float32)],
        ),
        compiler_params=pltpu.CompilerParams(
            dimension_semantics=("arbitrary",)),   # recurrence -> sequential grid
    )(gi_tm, whh_t, bhh)


# ------------------------- fused FC head (fc1->Mish->fc2) ----------------------
def fc_head_kernel(h_ref, w1_ref, b1_ref, w2_ref, b2_ref, o_ref):
    h = h_ref[...].astype(jnp.bfloat16)
    a = jnp.dot(h, w1_ref[...], preferred_element_type=jnp.float32) + b1_ref[...]
    m = a * jnp.tanh(jax.nn.softplus(a))                    # Mish in f32
    o_ref[...] = (jnp.dot(m.astype(jnp.bfloat16), w2_ref[...],
                          preferred_element_type=jnp.float32)
                  + b2_ref[...]).astype(o_ref.dtype)


def pallas_fc_head(h, w1_bf16, b1_row, w2_bf16, b2_row, *, nt_target=256):
    """h: (N, Hp) f32 -> (N, Op) f32, row-tiled and parallel across row tiles."""
    N, Hp = h.shape
    Fp = w1_bf16.shape[1]
    Op = w2_bf16.shape[1]
    nt = nt_target if N >= nt_target else _round_up(N, 8)
    n_pad = _round_up(N, nt)
    if n_pad != N:
        h = jnp.pad(h, ((0, n_pad - N), (0, 0)))
    out = pl.pallas_call(
        fc_head_kernel,
        out_shape=jax.ShapeDtypeStruct((n_pad, Op), jnp.float32),
        grid_spec=pltpu.PrefetchScalarGridSpec(
            num_scalar_prefetch=0,
            grid=(n_pad // nt,),
            in_specs=[pl.BlockSpec((nt, Hp), lambda i: (i, 0)),
                      pl.BlockSpec((Hp, Fp), lambda i: (0, 0)),
                      pl.BlockSpec((1, Fp), lambda i: (0, 0)),
                      pl.BlockSpec((Fp, Op), lambda i: (0, 0)),
                      pl.BlockSpec((1, Op), lambda i: (0, 0))],
            out_specs=pl.BlockSpec((nt, Op), lambda i: (i, 0)),
        ),
        compiler_params=pltpu.CompilerParams(
            dimension_semantics=("parallel",)),
    )(h, w1_bf16, b1_row, w2_bf16, b2_row)
    return out[:N]


# ----------------------------- weight preparation ------------------------------
def _prep_gru_layer(w_ih, w_hh, b_ih, b_hh, in_pad, h_pad):
    """PyTorch layout (3H, I), (3H, H), (3H,), (3H,) -> fused, padded, transposed:
    W_ih^T (in_pad, 3*h_pad) bf16, W_hh^T (h_pad, 3*h_pad) bf16, biases (1, 3*h_pad) f32.
    Gate blocks are padded individually so lane slices in the kernel stay aligned."""
    H = w_hh.shape[1]
    wih_t = jnp.concatenate(
        [_pad2(w_ih[g * H:(g + 1) * H].T, in_pad, h_pad) for g in range(3)], axis=1)
    whh_t = jnp.concatenate(
        [_pad2(w_hh[g * H:(g + 1) * H].T, h_pad, h_pad) for g in range(3)], axis=1)

    def padb(b):
        return jnp.concatenate(
            [jnp.pad(b[g * H:(g + 1) * H], (0, h_pad - H)) for g in range(3)]
        ).reshape(1, 3 * h_pad).astype(jnp.float32)

    return (wih_t.astype(jnp.bfloat16), whh_t.astype(jnp.bfloat16),
            padb(b_ih), padb(b_hh))


# -------------------------------- full forward --------------------------------
def gru_net_forward(x, params, *, time_chunk=32):
    """x: (B, T, n_mels) batch-first, like the PyTorch module."""
    B, T, I = x.shape
    H = params["gru"][0][1].shape[1]
    F = params["w1"].shape[1]
    O = params["w2"].shape[1]

    Bp = _round_up(B, 8)           # sublanes
    Hp = _round_up(H, 128)         # lanes
    Ip = _round_up(I, 128)
    Fp = _round_up(F, 128)
    Op = _round_up(O, 128)
    Tc = min(T, time_chunk)
    Tp = _round_up(T, Tc)

    # batch-first -> time-major, pad T (chunks), B (sublanes), I (lanes) with zeros
    x_tm = jnp.transpose(x, (1, 0, 2))
    x_tm = jnp.pad(x_tm, ((0, Tp - T), (0, Bp - B), (0, Ip - I)))

    h_tm = x_tm
    in_pad = Ip
    for (w_ih, w_hh, b_ih, b_hh) in params["gru"]:
        wih_t, whh_t, bih_p, bhh_p = _prep_gru_layer(w_ih, w_hh, b_ih, b_hh, in_pad, Hp)
        # hoisted input projection: one big (Tp*Bp, in_pad) x (in_pad, 3Hp) MXU matmul
        gi = pallas_linear(h_tm.reshape(Tp * Bp, in_pad), wih_t, bih_p)
        gi = gi.reshape(Tp, Bp, 3 * Hp)
        # serial recurrence: only the fused hidden matmul per step
        h_tm = gru_recurrence(gi, whh_t, bhh_p, Hp, Tc)
        in_pad = Hp
    # TODO(synk): inter-layer dropout (train-only) omitted in this inference pass.

    # FC head on the time-major flatten (row-order invariant); pad FC weights to lanes.
    w1p = _pad2(params["w1"], Hp, Fp).astype(jnp.bfloat16)
    b1p = jnp.pad(params["b1"], (0, Fp - F)).reshape(1, Fp)
    w2p = _pad2(params["w2"], Fp, Op).astype(jnp.bfloat16)
    b2p = jnp.pad(params["b2"], (0, Op - O)).reshape(1, Op)
    out = pallas_fc_head(h_tm.reshape(Tp * Bp, Hp), w1p, b1p, w2p, b2p)

    # only the small (.., O) output gets reordered back to batch-first
    out = out.reshape(Tp, Bp, Op)[:T, :B, :O]
    return jnp.transpose(out, (1, 0, 2))


# ------------------------------ param construction -----------------------------
def init_params(key, input_size, hidden_size, n_layers, fc_size, output_size):
    params = {"gru": []}
    k = 1.0 / jnp.sqrt(hidden_size)
    for layer in range(n_layers):
        in_sz = input_size if layer == 0 else hidden_size
        key, k1, k2, k3, k4 = jax.random.split(key, 5)
        w_ih = jax.random.uniform(k1, (3 * hidden_size, in_sz), jnp.float32, -k, k)
        w_hh = jax.random.uniform(k2, (3 * hidden_size, hidden_size), jnp.float32, -k, k)
        b_ih = jax.random.uniform(k3, (3 * hidden_size,), jnp.float32, -k, k)
        b_hh = jax.random.uniform(k4, (3 * hidden_size,), jnp.float32, -k, k)
        params["gru"].append((w_ih, w_hh, b_ih, b_hh))

    key, k1, k2, k3, k4 = jax.random.split(key, 5)
    k_fc1 = 1.0 / jnp.sqrt(hidden_size)
    params["w1"] = jax.random.uniform(k1, (hidden_size, fc_size), jnp.float32, -k_fc1, k_fc1)
    params["b1"] = jax.random.uniform(k2, (fc_size,), jnp.float32, -k_fc1, k_fc1)
    k_fc2 = 1.0 / jnp.sqrt(fc_size)
    params["w2"] = jax.random.uniform(k3, (fc_size, output_size), jnp.float32, -k_fc2, k_fc2)
    params["b2"] = jax.random.uniform(k4, (output_size,), jnp.float32, -k_fc2, k_fc2)
    return params


# ------------------------------ pure-JAX reference ------------------------------
def gru_net_reference(x, params):
    B, T, _ = x.shape
    h_seq = x
    for (w_ih, w_hh, b_ih, b_hh) in params["gru"]:
        H = w_hh.shape[1]
        h = jnp.zeros((B, H), jnp.float32)
        outs = []
        for t in range(T):
            xt = h_seq[:, t, :]
            gi = xt @ w_ih.T + b_ih
            gh = h @ w_hh.T + b_hh
            ir, iz, inn = jnp.split(gi, 3, axis=1)
            hr, hz, hn = jnp.split(gh, 3, axis=1)
            r = jax.nn.sigmoid(ir + hr)
            z = jax.nn.sigmoid(iz + hz)
            n = jnp.tanh(inn + r * hn)
            h = (1.0 - z) * n + z * h
            outs.append(h)
        h_seq = jnp.stack(outs, axis=1)
    flat = h_seq.reshape(B * T, -1)
    a = flat @ params["w1"] + params["b1"]
    m = a * jnp.tanh(jax.nn.softplus(a))
    o = m @ params["w2"] + params["b2"]
    return o.reshape(B, T, -1)


if __name__ == "__main__":
    # small shapes consistent with the module's forward
    B, T = 2, 8            # batch, sequence length
    n_mels = 16            # input_size (n_phoneme = 0)
    hidden_size = 32
    n_layers = 2
    fc_size = 64
    output_size = 16

    key = jax.random.PRNGKey(0)
    key, kx = jax.random.split(key)
    x = jax.random.normal(kx, (B, T, n_mels), jnp.float32)

    params = init_params(key, n_mels, hidden_size, n_layers, fc_size, output_size)

    out = jax.jit(gru_net_forward)(x, params)
    out = jax.block_until_ready(out)
    assert out.shape == (B, T, output_size), out.shape

    # bf16 weights / f32 accumulation -> loose tolerance vs. the f32 reference
    ref = gru_net_reference(x, params)
    assert bool(jnp.allclose(out, ref, atol=5e-2, rtol=5e-2)), \
        float(jnp.max(jnp.abs(out - ref)))

    print("KERNEL_OK")
</pallas_src>

<mosaic_0001>
module attributes {stable_mosaic.version = 11 : i64} {
  func.func @linear_kernel(%arg0: i32, %arg1: memref<64x128xf32, #tpu.memory_space<vmem>>, %arg2: memref<128x384xbf16, #tpu.memory_space<vmem>>, %arg3: memref<1x384xf32, #tpu.memory_space<vmem>>, %arg4: memref<64x384xf32, #tpu.memory_space<vmem>>) attributes {dimension_semantics = [#tpu.dimension_semantics<parallel>], iteration_bounds = array<i64: 1>, scalar_prefetch = 0 : i64, scratch_operands = 0 : i64, tpu.core_type = #tpu.core_type<tc>, window_params = [{transform_indices = @transform_0, window_bounds = array<i64: 64, 128>}, {pipeline_mode = #tpu.pipeline_mode<synchronous>, transform_indices = @transform_1, window_bounds = array<i64: 128, 384>}, {pipeline_mode = #tpu.pipeline_mode<synchronous>, transform_indices = @transform_2, window_bounds = array<i64: 1, 384>}, {transform_indices = @transform_3, window_bounds = array<i64: 64, 384>}]} {
    %c0 = arith.constant 0 : index
    %c0_0 = arith.constant 0 : index
    %0 = vector.load %arg1[%c0, %c0_0] : memref<64x128xf32, #tpu.memory_space<vmem>>, vector<64x128xf32>
    %1 = arith.truncf %0 : vector<64x128xf32> to vector<64x128xbf16>
    %c0_1 = arith.constant 0 : index
    %c0_2 = arith.constant 0 : index
    %2 = vector.load %arg2[%c0_1, %c0_2] : memref<128x384xbf16, #tpu.memory_space<vmem>>, vector<128x384xbf16>
    %cst = arith.constant dense<0.000000e+00> : vector<64x384xf32>
    %3 = tpu.matmul %1, %2, %cst {dimension_numbers = #tpu.dot_dimension_numbers<[1], [0], [0], [1], [0, 0, 1, 1], [], []>} : vector<64x128xbf16>, vector<128x384xbf16>, vector<64x384xf32> -> vector<64x384xf32>
    %c0_3 = arith.constant 0 : index
    %c0_4 = arith.constant 0 : index
    %4 = vector.load %arg3[%c0_3, %c0_4] : memref<1x384xf32, #tpu.memory_space<vmem>>, vector<1x384xf32>
    %5 = vector.broadcast %4 : vector<1x384xf32> to vector<64x384xf32>
    %6 = arith.addf %3, %5 : vector<64x384xf32>
    %c0_5 = arith.constant 0 : index
    %c0_6 = arith.constant 0 : index
    %7 = vector.load %arg4[%c0_5, %c0_6] : memref<64x384xf32, #tpu.memory_space<vmem>>, vector<64x384xf32>
    tpu.vector_store %arg4[%c0_5, %c0_6], %6 {strides = array<i32>} : memref<64x384xf32, #tpu.memory_space<vmem>>, vector<64x384xf32>,
    return
  }
  func.func @transform_0(%arg0: i32) -> (i32, i32) {
    %c0_i32 = arith.constant 0 : i32
    %c0_i32_0 = arith.constant 0 : i32
    return %arg0, %c0_i32 : i32, i32
  }
  func.func @transform_1(%arg0: i32) -> (i32, i32) {
    %c0_i32 = arith.constant 0 : i32
    %c0_i32_0 = arith.constant 0 : i32
    %c0_i32_1 = arith.constant 0 : i32
    return %c0_i32, %c0_i32_0 : i32, i32
  }
  func.func @transform_2(%arg0: i32) -> (i32, i32) {
    %c0_i32 = arith.constant 0 : i32
    %c0_i32_0 = arith.constant 0 : i32
    %c0_i32_1 = arith.constant 0 : i32
    return %c0_i32, %c0_i32_0 : i32, i32
  }
  func.func @transform_3(%arg0: i32) -> (i32, i32) {
    %c0_i32 = arith.constant 0 : i32
    %c0_i32_0 = arith.constant 0 : i32
    return %arg0, %c0_i32 : i32, i32
  }
}

module attributes {stable_mosaic.version = 11 : i64} {
  func.func @gru_chunk_kernel(%arg0: i32, %arg1: memref<8x8x384xf32, #tpu.memory_space<vmem>>, %arg2: memref<128x384xbf16, #tpu.memory_space<vmem>>, %arg3: memref<1x384xf32, #tpu.memory_space<vmem>>, %arg4: memref<8x8x128xf32, #tpu.memory_space<vmem>>, %arg5: memref<8x128xf32, #tpu.memory_space<vmem>>) attributes {dimension_semantics = [#tpu.dimension_semantics<arbitrary>], iteration_bounds = array<i64: 1>, scalar_prefetch = 0 : i64, scratch_operands = 1 : i64, tpu.core_type = #tpu.core_type<tc>, window_params = [{transform_indices = @transform_0, window_bounds = array<i64: 8, 8, 384>}, {pipeline_mode = #tpu.pipeline_mode<synchronous>, transform_indices = @transform_1, window_bounds = array<i64: 128, 384>}, {pipeline_mode = #tpu.pipeline_mode<synchronous>, transform_indices = @transform_2, window_bounds = array<i64: 1, 384>}, {transform_indices = @transform_3, window_bounds = array<i64: 8, 8, 128>}]} {
    %c0_i32 = arith.constant 0 : i32
    %0 = arith.cmpi eq, %arg0, %c0_i32 : i32
    %1 = arith.extui %0 : i1 to i32
    %c0_i32_0 = arith.constant 0 : i32
    %2 = arith.cmpi ne, %1, %c0_i32_0 : i32
    scf.if %2 {
      %cst_72 = arith.constant 0.000000e+00 : f32
      %303 = vector.broadcast %cst_72 : f32 to vector<8x128xf32>
      %c0_73 = arith.constant 0 : index
      %c0_74 = arith.constant 0 : index
      %304 = vector.load %arg5[%c0_73, %c0_74] : memref<8x128xf32, #tpu.memory_space<vmem>>, vector<8x128xf32>
      tpu.vector_store %arg5[%c0_73, %c0_74], %303 {strides = array<i32>} : memref<8x128xf32, #tpu.memory_space<vmem>>, vector<8x128xf32>,
    } else {
    }
    %c0 = arith.constant 0 : index
    %c0_1 = arith.constant 0 : index
    %3 = vector.load %arg2[%c0, %c0_1] : memref<128x384xbf16, #tpu.memory_space<vmem>>, vector<128x384xbf16>
    %c0_2 = arith.constant 0 : index
    %c0_3 = arith.constant 0 : index
    %4 = vector.load %arg3[%c0_2, %c0_3] : memref<1x384xf32, #tpu.memory_space<vmem>>, vector<1x384xf32>
    %c0_4 = arith.constant 0 : index
    %c0_5 = arith.constant 0 : index
    %5 = vector.load %arg5[%c0_4, %c0_5] : memref<8x128xf32, #tpu.memory_space<vmem>>, vector<8x128xf32>
    %c0_i32_6 = arith.constant 0 : i32
    %6 = arith.index_cast %c0_i32_6 : i32 to index
    %c0_7 = arith.constant 0 : index
    %c0_8 = arith.constant 0 : index
    %7 = vector.load %arg1[%6, %c0_7, %c0_8] : memref<8x8x384xf32, #tpu.memory_space<vmem>>, vector<1x8x384xf32>
    %8 = vector.shape_cast %7 : vector<1x8x384xf32> to vector<8x384xf32>
    %9 = arith.truncf %5 : vector<8x128xf32> to vector<8x128xbf16>
    %cst = arith.constant dense<0.000000e+00> : vector<8x384xf32>
    %10 = tpu.matmul %9, %3, %cst {dimension_numbers = #tpu.dot_dimension_numbers<[1], [0], [0], [1], [0, 0, 1, 1], [], []>} : vector<8x128xbf16>, vector<128x384xbf16>, vector<8x384xf32> -> vector<8x384xf32>
    %11 = vector.broadcast %4 : vector<1x384xf32> to vector<8x384xf32>
    %12 = arith.addf %10, %11 : vector<8x384xf32>
    %13 = vector.extract_strided_slice %8 {offsets = [0, 0], sizes = [8, 128], strides = [1, 1]} : vector<8x384xf32> to vector<8x128xf32>
    %14 = vector.extract_strided_slice %12 {offsets = [0, 0], sizes = [8, 128], strides = [1, 1]} : vector<8x384xf32> to vector<8x128xf32>
    %15 = arith.addf %13, %14 : vector<8x128xf32>
    %16 = arith.negf %15 : vector<8x128xf32>
    %17 = math.exp %16 : vector<8x128xf32>
    %cst_9 = arith.constant 1.000000e+00 : f32
    %18 = vector.broadcast %cst_9 : f32 to vector<8x128xf32>
    %19 = arith.addf %18, %17 : vector<8x128xf32>
    %20 = arith.divf %18, %19 : vector<8x128xf32>
    %21 = vector.extract_strided_slice %8 {offsets = [0, 128], sizes = [8, 128], strides = [1, 1]} : vector<8x384xf32> to vector<8x128xf32>
    %22 = vector.extract_strided_slice %12 {offsets = [0, 128], sizes = [8, 128], strides = [1, 1]} : vector<8x384xf32> to vector<8x128xf32>
    %23 = arith.addf %21, %22 : vector<8x128xf32>
    %24 = arith.negf %23 : vector<8x128xf32>
    %25 = math.exp %24 : vector<8x128xf32>
    %cst_10 = arith.constant 1.000000e+00 : f32
    %26 = vector.broadcast %cst_10 : f32 to vector<8x128xf32>
    %27 = arith.addf %26, %25 : vector<8x128xf32>
    %28 = arith.divf %26, %27 : vector<8x128xf32>
    %29 = vector.extract_strided_slice %8 {offsets = [0, 256], sizes = [8, 128], strides = [1, 1]} : vector<8x384xf32> to vector<8x128xf32>
    %30 = vector.extract_strided_slice %12 {offsets = [0, 256], sizes = [8, 128], strides = [1, 1]} : vector<8x384xf32> to vector<8x128xf32>
    %31 = arith.mulf %20, %30 : vector<8x128xf32>
    %32 = arith.addf %29, %31 : vector<8x128xf32>
    %33 = math.tanh %32 : vector<8x128xf32>
    %cst_11 = arith.constant 1.000000e+00 : f32
    %34 = vector.broadcast %cst_11 : f32 to vector<8x128xf32>
    %35 = arith.subf %34, %28 : vector<8x128xf32>
    %36 = arith.mulf %35, %33 : vector<8x128xf32>
    %37 = arith.mulf %28, %5 : vector<8x128xf32>
    %38 = arith.addf %36, %37 : vector<8x128xf32>
    %39 = arith.index_cast %c0_i32_6 : i32 to index
    %c0_12 = arith.constant 0 : index
    %c0_13 = arith.constant 0 : index
    %40 = vector.load %arg4[%39, %c0_12, %c0_13] : memref<8x8x128xf32, #tpu.memory_space<vmem>>, vector<1x8x128xf32>
    %41 = vector.shape_cast %40 : vector<1x8x128xf32> to vector<8x128xf32>
    %42 = vector.shape_cast %38 : vector<8x128xf32> to vector<1x8x128xf32>
    tpu.vector_store %arg4[%39, %c0_12, %c0_13], %42 {strides = array<i32>} : memref<8x8x128xf32, #tpu.memory_space<vmem>>, vector<1x8x128xf32>,
    %c1_i32 = arith.constant 1 : i32
    %43 = arith.index_cast %c1_i32 : i32 to index
    %c0_14 = arith.constant 0 : index
    %c0_15 = arith.constant 0 : index
    %44 = vector.load %arg1[%43, %c0_14, %c0_15] : memref<8x8x384xf32, #tpu.memory_space<vmem>>, vector<1x8x384xf32>
    %45 = vector.shape_cast %44 : vector<1x8x384xf32> to vector<8x384xf32>
    %46 = arith.truncf %38 : vector<8x128xf32> to vector<8x128xbf16>
    %cst_16 = arith.constant dense<0.000000e+00> : vector<8x384xf32>
    %47 = tpu.matmul %46, %3, %cst_16 {dimension_numbers = #tpu.dot_dimension_numbers<[1], [0], [0], [1], [0, 0, 1, 1], [], []>} : vector<8x128xbf16>, vector<128x384xbf16>, vector<8x384xf32> -> vector<8x384xf32>
    %48 = vector.broadcast %4 : vector<1x384xf32> to vector<8x384xf32>
    %49 = arith.addf %47, %48 : vector<8x384xf32>
    %50 = vector.extract_strided_slice %45 {offsets = [0, 0], sizes = [8, 128], strides = [1, 1]} : vector<8x384xf32> to vector<8x128xf32>
    %51 = vector.extract_strided_slice %49 {offsets = [0, 0], sizes = [8, 128], strides = [1, 1]} : vector<8x384xf32> to vector<8x128xf32>
    %52 = arith.addf %50, %51 : vector<8x128xf32>
    %53 = arith.negf %52 : vector<8x128xf32>
    %54 = math.exp %53 : vector<8x128xf32>
    %cst_17 = arith.constant 1.000000e+00 : f32
    %55 = vector.broadcast %cst_17 : f32 to vector<8x128xf32>
    %56 = arith.addf %55, %54 : vector<8x128xf32>
    %57 = arith.divf %55, %56 : vector<8x128xf32>
    %58 = vector.extract_strided_slice %45 {offsets = [0, 128], sizes = [8, 128], strides = [1, 1]} : vector<8x384xf32> to vector<8x128xf32>
    %59 = vector.extract_strided_slice %49 {offsets = [0, 128], sizes = [8, 128], strides = [1, 1]} : vector<8x384xf32> to vector<8x128xf32>
    %60 = arith.addf %58, %59 : vector<8x128xf32>
    %61 = arith.negf %60 : vector<8x128xf32>
    %62 = math.exp %61 : vector<8x128xf32>
    %cst_18 = arith.constant 1.000000e+00 : f32
    %63 = vector.broadcast %cst_18 : f32 to vector<8x128xf32>
    %64 = arith.addf %63, %62 : vector<8x128xf32>
    %65 = arith.divf %63, %64 : vector<8x128xf32>
    %66 = vector.extract_strided_slice %45 {offsets = [0, 256], sizes = [8, 128], strides = [1, 1]} : vector<8x384xf32> to vector<8x128xf32>
    %67 = vector.extract_strided_slice %49 {offsets = [0, 256], sizes = [8, 128], strides = [1, 1]} : vector<8x384xf32> to vector<8x128xf32>
    %68 = arith.mulf %57, %67 : vector<8x128xf32>
    %69 = arith.addf %66, %68 : vector<8x128xf32>
    %70 = math.tanh %69 : vector<8x128xf32>
    %cst_19 = arith.constant 1.000000e+00 : f32
    %71 = vector.broadcast %cst_19 : f32 to vector<8x128xf32>
    %72 = arith.subf %71, %65 : vector<8x128xf32>
    %73 = arith.mulf %72, %70 : vector<8x128xf32>
    %74 = arith.mulf %65, %38 : vector<8x128xf32>
    %75 = arith.addf %73, %74 : vector<8x128xf32>
    %76 = arith.index_cast %c1_i32 : i32 to index
    %c0_20 = arith.constant 0 : index
    %c0_21 = arith.constant 0 : index
    %77 = vector.load %arg4[%76, %c0_20, %c0_21] : memref<8x8x128xf32, #tpu.memory_space<vmem>>, vector<1x8x128xf32>
    %78 = vector.shape_cast %77 : vector<1x8x128xf32> to vector<8x128xf32>
    %79 = vector.shape_cast %75 : vector<8x128xf32> to vector<1x8x128xf32>
    tpu.vector_store %arg4[%76, %c0_20, %c0_21], %79 {strides = array<i32>} : memref<8x8x128xf32, #tpu.memory_space<vmem>>, vector<1x8x128xf32>,
    %c2_i32 = arith.constant 2 : i32
    %80 = arith.index_cast %c2_i32 : i32 to index
    %c0_22 = arith.constant 0 : index
    %c0_23 = arith.constant 0 : index
    %81 = vector.load %arg1[%80, %c0_22, %c0_23] : memref<8x8x384xf32, #tpu.memory_space<vmem>>, vector<1x8x384xf32>
    %82 = vector.shape_cast %81 : vector<1x8x384xf32> to vector<8x384xf32>
    %83 = arith.truncf %75 : vector<8x128xf32> to vector<8x128xbf16>
    %cst_24 = arith.constant dense<0.000000e+00> : vector<8x384xf32>
    %84 = tpu.matmul %83, %3, %cst_24 {dimension_numbers = #tpu.dot_dimension_numbers<[1], [0], [0], [1], [0, 0, 1, 1], [], []>} : vector<8x128xbf16>, vector<128x384xbf16>, vector<8x384xf32> -> vector<8x384xf32>
    %85 = vector.broadcast %4 : vector<1x384xf32> to vector<8x384xf32>
    %86 = arith.addf %84, %85 : vector<8x384xf32>
    %87 = vector.extract_strided_slice %82 {offsets = [0, 0], sizes = [8, 128], strides = [1, 1]} : vector<8x384xf32> to vector<8x128xf32>
    %88 = vector.extract_strided_slice %86 {offsets = [0, 0], sizes = [8, 128], strides = [1, 1]} : vector<8x384xf32> to vector<8x128xf32>
    %89 = arith.addf %87, %88 : vector<8x128xf32>
    %90 = arith.negf %89 : vector<8x128xf32>
    %91 = math.exp %90 : vector<8x128xf32>
    %cst_25 = arith.constant 1.000000e+00 : f32
    %92 = vector.broadcast %cst_25 : f32 to vector<8x128xf32>
    %93 = arith.addf %92, %91 : vector<8x128xf32>
    %94 = arith.divf %92, %93 : vector<8x128xf32>
    %95 = vector.extract_strided_slice %82 {offsets = [0, 128], sizes = [8, 128], strides = [1, 1]} : vector<8x384xf32> to vector<8x128xf32>
    %96 = vector.extract_strided_slice %86 {offsets = [0, 128], sizes = [8, 128], strides = [1, 1]} : vector<8x384xf32> to vector<8x128xf32>
    %97 = arith.addf %95, %96 : vector<8x128xf32>
    %98 = arith.negf %97 : vector<8x128xf32>
    %99 = math.exp %98 : vector<8x128xf32>
    %cst_26 = arith.constant 1.000000e+00 : f32
    %100 = vector.broadcast %cst_26 : f32 to vector<8x128xf32>
    %101 = arith.addf %100, %99 : vector<8x128xf32>
    %102 = arith.divf %100, %101 : vector<8x128xf32>
    %103 = vector.extract_strided_slice %82 {offsets = [0, 256], sizes = [8, 128], strides = [1, 1]} : vector<8x384xf32> to vector<8x128xf32>
    %104 = vector.extract_strided_slice %86 {offsets = [0, 256], sizes = [8, 128], strides = [1, 1]} : vector<8x384xf32> to vector<8x128xf32>
    %105 = arith.mulf %94, %104 : vector<8x128xf32>
    %106 = arith.addf %103, %105 : vector<8x128xf32>
    %107 = math.tanh %106 : vector<8x128xf32>
    %cst_27 = arith.constant 1.000000e+00 : f32
    %108 = vector.broadcast %cst_27 : f32 to vector<8x128xf32>
    %109 = arith.subf %108, %102 : vector<8x128xf32>
    %110 = arith.mulf %109, %107 : vector<8x128xf32>
    %111 = arith.mulf %102, %75 : vector<8x128xf32>
    %112 = arith.addf %110, %111 : vector<8x128xf32>
    %113 = arith.index_cast %c2_i32 : i32 to index
    %c0_28 = arith.constant 0 : index
    %c0_29 = arith.constant 0 : index
    %114 = vector.load %arg4[%113, %c0_28, %c0_29] : memref<8x8x128xf32, #tpu.memory_space<vmem>>, vector<1x8x128xf32>
    %115 = vector.shape_cast %114 : vector<1x8x128xf32> to vector<8x128xf32>
    %116 = vector.shape_cast %112 : vector<8x128xf32> to vector<1x8x128xf32>
    tpu.vector_store %arg4[%113, %c0_28, %c0_29], %116 {strides = array<i32>} : memref<8x8x128xf32, #tpu.memory_space<vmem>>, vector<1x8x128xf32>,
    %c3_i32 = arith.constant 3 : i32
    %117 = arith.index_cast %c3_i32 : i32 to index
    %c0_30 = arith.constant 0 : index
    %c0_31 = arith.constant 0 : index
    %118 = vector.load %arg1[%117, %c0_30, %c0_31] : memref<8x8x384xf32, #tpu.memory_space<vmem>>, vector<1x8x384xf32>
    %119 = vector.shape_cast %118 : vector<1x8x384xf32> to vector<8x384xf32>
    %120 = arith.truncf %112 : vector<8x128xf32> to vector<8x128xbf16>
    %cst_32 = arith.constant dense<0.000000e+00> : vector<8x384xf32>
    %121 = tpu.matmul %120, %3, %cst_32 {dimension_numbers = #tpu.dot_dimension_numbers<[1], [0], [0], [1], [0, 0, 1, 1], [], []>} : vector<8x128xbf16>, vector<128x384xbf16>, vector<8x384xf32> -> vector<8x384xf32>
    %122 = vector.broadcast %4 : vector<1x384xf32> to vector<8x384xf32>
    %123 = arith.addf %121, %122 : vector<8x384xf32>
    %124 = vector.extract_strided_slice %119 {offsets = [0, 0], sizes = [8, 128], strides = [1, 1]} : vector<8x384xf32> to vector<8x128xf32>
    %125 = vector.extract_strided_slice %123 {offsets = [0, 0], sizes = [8, 128], strides = [1, 1]} : vector<8x384xf32> to vector<8x128xf32>
    %126 = arith.addf %124, %125 : vector<8x128xf32>
    %127 = arith.negf %126 : vector<8x128xf32>
    %128 = math.exp %127 : vector<8x128xf32>
    %cst_33 = arith.constant 1.000000e+00 : f32
    %129 = vector.broadcast %cst_33 : f32 to vector<8x128xf32>
    %130 = arith.addf %129, %128 : vector<8x128xf32>
    %131 = arith.divf %129, %130 : vector<8x128xf32>
    %132 = vector.extract_strided_slice %119 {offsets = [0, 128], sizes = [8, 128], strides = [1, 1]} : vector<8x384xf32> to vector<8x128xf32>
    %133 = vector.extract_strided_slice %123 {offsets = [0, 128], sizes = [8, 128], strides = [1, 1]} : vector<8x384xf32> to vector<8x128xf32>
    %134 = arith.addf %132, %133 : vector<8x128xf32>
    %135 = arith.negf %134 : vector<8x128xf32>
    %136 = math.exp %135 : vector<8x128xf32>
    %cst_34 = arith.constant 1.000000e+00 : f32
    %137 = vector.broadcast %cst_34 : f32 to vector<8x128xf32>
    %138 = arith.addf %137, %136 : vector<8x128xf32>
    %139 = arith.divf %137, %138 : vector<8x128xf32>
    %140 = vector.extract_strided_slice %119 {offsets = [0, 256], sizes = [8, 128], strides = [1, 1]} : vector<8x384xf32> to vector<8x128xf32>
    %141 = vector.extract_strided_slice %123 {offsets = [0, 256], sizes = [8, 128], strides = [1, 1]} : vector<8x384xf32> to vector<8x128xf32>
    %142 = arith.mulf %131, %141 : vector<8x128xf32>
    %143 = arith.addf %140, %142 : vector<8x128xf32>
    %144 = math.tanh %143 : vector<8x128xf32>
    %cst_35 = arith.constant 1.000000e+00 : f32
    %145 = vector.broadcast %cst_35 : f32 to vector<8x128xf32>
    %146 = arith.subf %145, %139 : vector<8x128xf32>
    %147 = arith.mulf %146, %144 : vector<8x128xf32>
    %148 = arith.mulf %139, %112 : vector<8x128xf32>
    %149 = arith.addf %147, %148 : vector<8x128xf32>
    %150 = arith.index_cast %c3_i32 : i32 to index
    %c0_36 = arith.constant 0 : index
    %c0_37 = arith.constant 0 : index
    %151 = vector.load %arg4[%150, %c0_36, %c0_37] : memref<8x8x128xf32, #tpu.memory_space<vmem>>, vector<1x8x128xf32>
    %152 = vector.shape_cast %151 : vector<1x8x128xf32> to vector<8x128xf32>
    %153 = vector.shape_cast %149 : vector<8x128xf32> to vector<1x8x128xf32>
    tpu.vector_store %arg4[%150, %c0_36, %c0_37], %153 {strides = array<i32>} : memref<8x8x128xf32, #tpu.memory_space<vmem>>, vector<1x8x128xf32>,
    %c4_i32 = arith.constant 4 : i32
    %154 = arith.index_cast %c4_i32 : i32 to index
    %c0_38 = arith.constant 0 : index
    %c0_39 = arith.constant 0 : index
    %155 = vector.load %arg1[%154, %c0_38, %c0_39] : memref<8x8x384xf32, #tpu.memory_space<vmem>>, vector<1x8x384xf32>
    %156 = vector.shape_cast %155 : vector<1x8x384xf32> to vector<8x384xf32>
    %157 = arith.truncf %149 : vector<8x128xf32> to vector<8x128xbf16>
    %cst_40 = arith.constant dense<0.000000e+00> : vector<8x384xf32>
    %158 = tpu.matmul %157, %3, %cst_40 {dimension_numbers = #tpu.dot_dimension_numbers<[1], [0], [0], [1], [0, 0, 1, 1], [], []>} : vector<8x128xbf16>, vector<128x384xbf16>, vector<8x384xf32> -> vector<8x384xf32>
    %159 = vector.broadcast %4 : vector<1x384xf32> to vector<8x384xf32>
    %160 = arith.addf %158, %159 : vector<8x384xf32>
    %161 = vector.extract_strided_slice %156 {offsets = [0, 0], sizes = [8, 128], strides = [1, 1]} : vector<8x384xf32> to vector<8x128xf32>
    %162 = vector.extract_strided_slice %160 {offsets = [0, 0], sizes = [8, 128], strides = [1, 1]} : vector<8x384xf32> to vector<8x128xf32>
    %163 = arith.addf %161, %162 : vector<8x128xf32>
    %164 = arith.negf %163 : vector<8x128xf32>
    %165 = math.exp %164 : vector<8x128xf32>
    %cst_41 = arith.constant 1.000000e+00 : f32
    %166 = vector.broadcast %cst_41 : f32 to vector<8x128xf32>
    %167 = arith.addf %166, %165 : vector<8x128xf32>
    %168 = arith.divf %166, %167 : vector<8x128xf32>
    %169 = vector.extract_strided_slice %156 {offsets = [0, 128], sizes = [8, 128], strides = [1, 1]} : vector<8x384xf32> to vector<8x128xf32>
    %170 = vector.extract_strided_slice %160 {offsets = [0, 128], sizes = [8, 128], strides = [1, 1]} : vector<8x384xf32> to vector<8x128xf32>
    %171 = arith.addf %169, %170 : vector<8x128xf32>
    %172 = arith.negf %171 : vector<8x128xf32>
    %173 = math.exp %172 : vector<8x128xf32>
    %cst_42 = arith.constant 1.000000e+00 : f32
    %174 = vector.broadcast %cst_42 : f32 to vector<8x128xf32>
    %175 = arith.addf %174, %173 : vector<8x128xf32>
    %176 = arith.divf %174, %175 : vector<8x128xf32>
    %177 = vector.extract_strided_slice %156 {offsets = [0, 256], sizes = [8, 128], strides = [1, 1]} : vector<8x384xf32> to vector<8x128xf32>
    %178 = vector.extract_strided_slice %160 {offsets = [0, 256], sizes = [8, 128], strides = [1, 1]} : vector<8x384xf32> to vector<8x128xf32>
    %179 = arith.mulf %168, %178 : vector<8x128xf32>
    %180 = arith.addf %177, %179 : vector<8x128xf32>
    %181 = math.tanh %180 : vector<8x128xf32>
    %cst_43 = arith.constant 1.000000e+00 : f32
    %182 = vector.broadcast %cst_43 : f32 to vector<8x128xf32>
    %183 = arith.subf %182, %176 : vector<8x128xf32>
    %184 = arith.mulf %183, %181 : vector<8x128xf32>
    %185 = arith.mulf %176, %149 : vector<8x128xf32>
    %186 = arith.addf %184, %185 : vector<8x128xf32>
    %187 = arith.index_cast %c4_i32 : i32 to index
    %c0_44 = arith.constant 0 : index
    %c0_45 = arith.constant 0 : index
    %188 = vector.load %arg4[%187, %c0_44, %c0_45] : memref<8x8x128xf32, #tpu.memory_space<vmem>>, vector<1x8x128xf32>
    %189 = vector.shape_cast %188 : vector<1x8x128xf32> to vector<8x128xf32>
    %190 = vector.shape_cast %186 : vector<8x128xf32> to vector<1x8x128xf32>
    tpu.vector_store %arg4[%187, %c0_44, %c0_45], %190 {strides = array<i32>} : memref<8x8x128xf32, #tpu.memory_space<vmem>>, vector<1x8x128xf32>,
    %c5_i32 = arith.constant 5 : i32
    %191 = arith.index_cast %c5_i32 : i32 to index
    %c0_46 = arith.constant 0 : index
    %c0_47 = arith.constant 0 : index
    %192 = vector.load %arg1[%191, %c0_46, %c0_47] : memref<8x8x384xf32, #tpu.memory_space<vmem>>, vector<1x8x384xf32>
    %193 = vector.shape_cast %192 : vector<1x8x384xf32> to vector<8x384xf32>
    %194 = arith.truncf %186 : vector<8x128xf32> to vector<8x128xbf16>
    %cst_48 = arith.constant dense<0.000000e+00> : vector<8x384xf32>
    %195 = tpu.matmul %194, %3, %cst_48 {dimension_numbers = #tpu.dot_dimension_numbers<[1], [0], [0], [1], [0, 0, 1, 1], [], []>} : vector<8x128xbf16>, vector<128x384xbf16>, vector<8x384xf32> -> vector<8x384xf32>
    %196 = vector.broadcast %4 : vector<1x384xf32> to vector<8x384xf32>
    %197 = arith.addf %195, %196 : vector<8x384xf32>
    %198 = vector.extract_strided_slice %193 {offsets = [0, 0], sizes = [8, 128], strides = [1, 1]} : vector<8x384xf32> to vector<8x128xf32>
    %199 = vector.extract_strided_slice %197 {offsets = [0, 0], sizes = [8, 128], strides = [1, 1]} : vector<8x384xf32> to vector<8x128xf32>
    %200 = arith.addf %198, %199 : vector<8x128xf32>
    %201 = arith.negf %200 : vector<8x128xf32>
    %202 = math.exp %201 : vector<8x128xf32>
    %cst_49 = arith.constant 1.000000e+00 : f32
    %203 = vector.broadcast %cst_49 : f32 to vector<8x128xf32>
    %204 = arith.addf %203, %202 : vector<8x128xf32>
    %205 = arith.divf %203, %204 : vector<8x128xf32>
    %206 = vector.extract_strided_slice %193 {offsets = [0, 128], sizes = [8, 128], strides = [1, 1]} : vector<8x384xf32> to vector<8x128xf32>
    %207 = vector.extract_strided_slice %197 {offsets = [0, 128], sizes = [8, 128], strides = [1, 1]} : vector<8x384xf32> to vector<8x128xf32>
    %208 = arith.addf %206, %207 : vector<8x128xf32>
    %209 = arith.negf %208 : vector<8x128xf32>
    %210 = math.exp %209 : vector<8x128xf32>
    %cst_50 = arith.constant 1.000000e+00 : f32
    %211 = vector.broadcast %cst_50 : f32 to vector<8x128xf32>
    %212 = arith.addf %211, %210 : vector<8x128xf32>
    %213 = arith.divf %211, %212 : vector<8x128xf32>
    %214 = vector.extract_strided_slice %193 {offsets = [0, 256], sizes = [8, 128], strides = [1, 1]} : vector<8x384xf32> to vector<8x128xf32>
    %215 = vector.extract_strided_slice %197 {offsets = [0, 256], sizes = [8, 128], strides = [1, 1]} : vector<8x384xf32> to vector<8x128xf32>
    %216 = arith.mulf %205, %215 : vector<8x128xf32>
    %217 = arith.addf %214, %216 : vector<8x128xf32>
    %218 = math.tanh %217 : vector<8x128xf32>
    %cst_51 = arith.constant 1.000000e+00 : f32
    %219 = vector.broadcast %cst_51 : f32 to vector<8x128xf32>
    %220 = arith.subf %219, %213 : vector<8x128xf32>
    %221 = arith.mulf %220, %218 : vector<8x128xf32>
    %222 = arith.mulf %213, %186 : vector<8x128xf32>
    %223 = arith.addf %221, %222 : vector<8x128xf32>
    %224 = arith.index_cast %c5_i32 : i32 to index
    %c0_52 = arith.constant 0 : index
    %c0_53 = arith.constant 0 : index
    %225 = vector.load %arg4[%224, %c0_52, %c0_53] : memref<8x8x128xf32, #tpu.memory_space<vmem>>, vector<1x8x128xf32>
    %226 = vector.shape_cast %225 : vector<1x8x128xf32> to vector<8x128xf32>
    %227 = vector.shape_cast %223 : vector<8x128xf32> to vector<1x8x128xf32>
    tpu.vector_store %arg4[%224, %c0_52, %c0_53], %227 {strides = array<i32>} : memref<8x8x128xf32, #tpu.memory_space<vmem>>, vector<1x8x128xf32>,
    %c6_i32 = arith.constant 6 : i32
    %228 = arith.index_cast %c6_i32 : i32 to index
    %c0_54 = arith.constant 0 : index
    %c0_55 = arith.constant 0 : index
    %229 = vector.load %arg1[%228, %c0_54, %c0_55] : memref<8x8x384xf32, #tpu.memory_space<vmem>>, vector<1x8x384xf32>
    %230 = vector.shape_cast %229 : vector<1x8x384xf32> to vector<8x384xf32>
    %231 = arith.truncf %223 : vector<8x128xf32> to vector<8x128xbf16>
    %cst_56 = arith.constant dense<0.000000e+00> : vector<8x384xf32>
    %232 = tpu.matmul %231, %3, %cst_56 {dimension_numbers = #tpu.dot_dimension_numbers<[1], [0], [0], [1], [0, 0, 1, 1], [], []>} : vector<8x128xbf16>, vector<128x384xbf16>, vector<8x384xf32> -> vector<8x384xf32>
    %233 = vector.broadcast %4 : vector<1x384xf32> to vector<8x384xf32>
    %234 = arith.addf %232, %233 : vector<8x384xf32>
    %235 = vector.extract_strided_slice %230 {offsets = [0, 0], sizes = [8, 128], strides = [1, 1]} : vector<8x384xf32> to vector<8x128xf32>
    %236 = vector.extract_strided_slice %234 {offsets = [0, 0], sizes = [8, 128], strides = [1, 1]} : vector<8x384xf32> to vector<8x128xf32>
    %237 = arith.addf %235, %236 : vector<8x128xf32>
    %238 = arith.negf %237 : vector<8x128xf32>
    %239 = math.exp %238 : vector<8x128xf32>
    %cst_57 = arith.constant 1.000000e+00 : f32
    %240 = vector.broadcast %cst_57 : f32 to vector<8x128xf32>
    %241 = arith.addf %240, %239 : vector<8x128xf32>
    %242 = arith.divf %240, %241 : vector<8x128xf32>
    %243 = vector.extract_strided_slice %230 {offsets = [0, 128], sizes = [8, 128], strides = [1, 1]} : vector<8x384xf32> to vector<8x128xf32>
    %244 = vector.extract_strided_slice %234 {offsets = [0, 128], sizes = [8, 128], strides = [1, 1]} : vector<8x384xf32> to vector<8x128xf32>
    %245 = arith.addf %243, %244 : vector<8x128xf32>
    %246 = arith.negf %245 : vector<8x128xf32>
    %247 = math.exp %246 : vector<8x128xf32>
    %cst_58 = arith.constant 1.000000e+00 : f32
    %248 = vector.broadcast %cst_58 : f32 to vector<8x128xf32>
    %249 = arith.addf %248, %247 : vector<8x128xf32>
    %250 = arith.divf %248, %249 : vector<8x128xf32>
    %251 = vector.extract_strided_slice %230 {offsets = [0, 256], sizes = [8, 128], strides = [1, 1]} : vector<8x384xf32> to vector<8x128xf32>
    %252 = vector.extract_strided_slice %234 {offsets = [0, 256], sizes = [8, 128], strides = [1, 1]} : vector<8x384xf32> to vector<8x128xf32>
    %253 = arith.mulf %242, %252 : vector<8x128xf32>
    %254 = arith.addf %251, %253 : vector<8x128xf32>
    %255 = math.tanh %254 : vector<8x128xf32>
    %cst_59 = arith.constant 1.000000e+00 : f32
    %256 = vector.broadcast %cst_59 : f32 to vector<8x128xf32>
    %257 = arith.subf %256, %250 : vector<8x128xf32>
    %258 = arith.mulf %257, %255 : vector<8x128xf32>
    %259 = arith.mulf %250, %223 : vector<8x128xf32>
    %260 = arith.addf %258, %259 : vector<8x128xf32>
    %261 = arith.index_cast %c6_i32 : i32 to index
    %c0_60 = arith.constant 0 : index
    %c0_61 = arith.constant 0 : index
    %262 = vector.load %arg4[%261, %c0_60, %c0_61] : memref<8x8x128xf32, #tpu.memory_space<vmem>>, vector<1x8x128xf32>
    %263 = vector.shape_cast %262 : vector<1x8x128xf32> to vector<8x128xf32>
    %264 = vector.shape_cast %260 : vector<8x128xf32> to vector<1x8x128xf32>
    tpu.vector_store %arg4[%261, %c0_60, %c0_61], %264 {strides = array<i32>} : memref<8x8x128xf32, #tpu.memory_space<vmem>>, vector<1x8x128xf32>,
    %c7_i32 = arith.constant 7 : i32
    %265 = arith.index_cast %c7_i32 : i32 to index
    %c0_62 = arith.constant 0 : index
    %c0_63 = arith.constant 0 : index
    %266 = vector.load %arg1[%265, %c0_62, %c0_63] : memref<8x8x384xf32, #tpu.memory_space<vmem>>, vector<1x8x384xf32>
    %267 = vector.shape_cast %266 : vector<1x8x384xf32> to vector<8x384xf32>
    %268 = arith.truncf %260 : vector<8x128xf32> to vector<8x128xbf16>
    %cst_64 = arith.constant dense<0.000000e+00> : vector<8x384xf32>
    %269 = tpu.matmul %268, %3, %cst_64 {dimension_numbers = #tpu.dot_dimension_numbers<[1], [0], [0], [1], [0, 0, 1, 1], [], []>} : vector<8x128xbf16>, vector<128x384xbf16>, vector<8x384xf32> -> vector<8x384xf32>
    %270 = vector.broadcast %4 : vector<1x384xf32> to vector<8x384xf32>
    %271 = arith.addf %269, %270 : vector<8x384xf32>
    %272 = vector.extract_strided_slice %267 {offsets = [0, 0], sizes = [8, 128], strides = [1, 1]} : vector<8x384xf32> to vector<8x128xf32>
    %273 = vector.extract_strided_slice %271 {offsets = [0, 0], sizes = [8, 128], strides = [1, 1]} : vector<8x384xf32> to vector<8x128xf32>
    %274 = arith.addf %272, %273 : vector<8x128xf32>
    %275 = arith.negf %274 : vector<8x128xf32>
    %276 = math.exp %275 : vector<8x128xf32>
    %cst_65 = arith.constant 1.000000e+00 : f32
    %277 = vector.broadcast %cst_65 : f32 to vector<8x128xf32>
    %278 = arith.addf %277, %276 : vector<8x128xf32>
    %279 = arith.divf %277, %278 : vector<8x128xf32>
    %280 = vector.extract_strided_slice %267 {offsets = [0, 128], sizes = [8, 128], strides = [1, 1]} : vector<8x384xf32> to vector<8x128xf32>
    %281 = vector.extract_strided_slice %271 {offsets = [0, 128], sizes = [8, 128], strides = [1, 1]} : vector<8x384xf32> to vector<8x128xf32>
    %282 = arith.addf %280, %281 : vector<8x128xf32>
    %283 = arith.negf %282 : vector<8x128xf32>
    %284 = math.exp %283 : vector<8x128xf32>
    %cst_66 = arith.constant 1.000000e+00 : f32
    %285 = vector.broadcast %cst_66 : f32 to vector<8x128xf32>
    %286 = arith.addf %285, %284 : vector<8x128xf32>
    %287 = arith.divf %285, %286 : vector<8x128xf32>
    %288 = vector.extract_strided_slice %267 {offsets = [0, 256], sizes = [8, 128], strides = [1, 1]} : vector<8x384xf32> to vector<8x128xf32>
    %289 = vector.extract_strided_slice %271 {offsets = [0, 256], sizes = [8, 128], strides = [1, 1]} : vector<8x384xf32> to vector<8x128xf32>
    %290 = arith.mulf %279, %289 : vector<8x128xf32>
    %291 = arith.addf %288, %290 : vector<8x128xf32>
    %292 = math.tanh %291 : vector<8x128xf32>
    %cst_67 = arith.constant 1.000000e+00 : f32
    %293 = vector.broadcast %cst_67 : f32 to vector<8x128xf32>
    %294 = arith.subf %293, %287 : vector<8x128xf32>
    %295 = arith.mulf %294, %292 : vector<8x128xf32>
    %296 = arith.mulf %287, %260 : vector<8x128xf32>
    %297 = arith.addf %295, %296 : vector<8x128xf32>
    %298 = arith.index_cast %c7_i32 : i32 to index
    %c0_68 = arith.constant 0 : index
    %c0_69 = arith.constant 0 : index
    %299 = vector.load %arg4[%298, %c0_68, %c0_69] : memref<8x8x128xf32, #tpu.memory_space<vmem>>, vector<1x8x128xf32>
    %300 = vector.shape_cast %299 : vector<1x8x128xf32> to vector<8x128xf32>
    %301 = vector.shape_cast %297 : vector<8x128xf32> to vector<1x8x128xf32>
    tpu.vector_store %arg4[%298, %c0_68, %c0_69], %301 {strides = array<i32>} : memref<8x8x128xf32, #tpu.memory_space<vmem>>, vector<1x8x128xf32>,
    %c8_i32 = arith.constant 8 : i32
    %c0_70 = arith.constant 0 : index
    %c0_71 = arith.constant 0 : index
    %302 = vector.load %arg5[%c0_70, %c0_71] : memref<8x128xf32, #tpu.memory_space<vmem>>, vector<8x128xf32>
    tpu.vector_store %arg5[%c0_70, %c0_71], %297 {strides = array<i32>} : memref<8x128xf32, #tpu.memory_space<vmem>>, vector<8x128xf32>,
    return
  }
  func.func @transform_0(%arg0: i32) -> (i32, i32, i32) {
    %c0_i32 = arith.constant 0 : i32
    %c0_i32_0 = arith.constant 0 : i32
    %c0_i32_1 = arith.constant 0 : i32
    return %arg0, %c0_i32, %c0_i32_0 : i32, i32, i32
  }
  func.func @transform_1(%arg0: i32) -> (i32, i32) {
    %c0_i32 = arith.constant 0 : i32
    %c0_i32_0 = arith.constant 0 : i32
    %c0_i32_1 = arith.constant 0 : i32
    return %c0_i32, %c0_i32_0 : i32, i32
  }
  func.func @transform_2(%arg0: i32) -> (i32, i32) {
    %c0_i32 = arith.constant 0 : i32
    %c0_i32_0 = arith.constant 0 : i32
    %c0_i32_1 = arith.constant 0 : i32
    return %c0_i32, %c0_i32_0 : i32, i32
  }
  func.func @transform_3(%arg0: i32) -> (i32, i32, i32) {
    %c0_i32 = arith.constant 0 : i32
    %c0_i32_0 = arith.constant 0 : i32
    %c0_i32_1 = arith.constant 0 : i32
    return %arg0, %c0_i32, %c0_i32_0 : i32, i32, i32
  }
}

module attributes {stable_mosaic.version = 11 : i64} {
  func.func @fc_head_kernel(%arg0: i32, %arg1: memref<64x128xf32, #tpu.memory_space<vmem>>, %arg2: memref<128x128xbf16, #tpu.memory_space<vmem>>, %arg3: memref<1x128xf32, #tpu.memory_space<vmem>>, %arg4: memref<128x128xbf16, #tpu.memory_space<vmem>>, %arg5: memref<1x128xf32, #tpu.memory_space<vmem>>, %arg6: memref<64x128xf32, #tpu.memory_space<vmem>>) attributes {dimension_semantics = [#tpu.dimension_semantics<parallel>], iteration_bounds = array<i64: 1>, scalar_prefetch = 0 : i64, scratch_operands = 0 : i64, tpu.core_type = #tpu.core_type<tc>, window_params = [{transform_indices = @transform_0, window_bounds = array<i64: 64, 128>}, {pipeline_mode = #tpu.pipeline_mode<synchronous>, transform_indices = @transform_1, window_bounds = array<i64: 128, 128>}, {pipeline_mode = #tpu.pipeline_mode<synchronous>, transform_indices = @transform_2, window_bounds = array<i64: 1, 128>}, {pipeline_mode = #tpu.pipeline_mode<synchronous>, transform_indices = @transform_3, window_bounds = array<i64: 128, 128>}, {pipeline_mode = #tpu.pipeline_mode<synchronous>, transform_indices = @transform_4, window_bounds = array<i64: 1, 128>}, {transform_indices = @transform_5, window_bounds = array<i64: 64, 128>}]} {
    %c0 = arith.constant 0 : index
    %c0_0 = arith.constant 0 : index
    %0 = vector.load %arg1[%c0, %c0_0] : memref<64x128xf32, #tpu.memory_space<vmem>>, vector<64x128xf32>
    %1 = arith.truncf %0 : vector<64x128xf32> to vector<64x128xbf16>
    %c0_1 = arith.constant 0 : index
    %c0_2 = arith.constant 0 : index
    %2 = vector.load %arg2[%c0_1, %c0_2] : memref<128x128xbf16, #tpu.memory_space<vmem>>, vector<128x128xbf16>
    %cst = arith.constant dense<0.000000e+00> : vector<64x128xf32>
    %3 = tpu.matmul %1, %2, %cst {dimension_numbers = #tpu.dot_dimension_numbers<[1], [0], [0], [1], [0, 0, 1, 1], [], []>} : vector<64x128xbf16>, vector<128x128xbf16>, vector<64x128xf32> -> vector<64x128xf32>
    %c0_3 = arith.constant 0 : index
    %c0_4 = arith.constant 0 : index
    %4 = vector.load %arg3[%c0_3, %c0_4] : memref<1x128xf32, #tpu.memory_space<vmem>>, vector<1x128xf32>
    %5 = vector.broadcast %4 : vector<1x128xf32> to vector<64x128xf32>
    %6 = arith.addf %3, %5 : vector<64x128xf32>
    %cst_5 = arith.constant 0.000000e+00 : f32
    %7 = vector.broadcast %cst_5 : f32 to vector<64x128xf32>
    %8 = arith.maximumf %6, %7 : vector<64x128xf32>
    %9 = vector.broadcast %cst_5 : f32 to vector<64x128xf32>
    %10 = arith.subf %6, %9 : vector<64x128xf32>
    %11 = arith.cmpf one, %10, %10 : vector<64x128xf32>
    %12 = vector.broadcast %cst_5 : f32 to vector<64x128xf32>
    %13 = arith.addf %6, %12 : vector<64x128xf32>
    %14 = math.absf %10 : vector<64x128xf32>
    %cst_6 = arith.constant 0.000000e+00 : f32
    %15 = vector.broadcast %cst_6 : f32 to vector<64x128xf32>
    %16 = arith.subf %15, %14 : vector<64x128xf32>
    %17 = math.exp %16 : vector<64x128xf32>
    %18 = math.log1p %17 : vector<64x128xf32>
    %19 = arith.addf %8, %18 : vector<64x128xf32>
    %20 = arith.select %11, %13, %19 : vector<64x128xi1>, vector<64x128xf32>
    %21 = math.tanh %20 : vector<64x128xf32>
    %22 = arith.mulf %6, %21 : vector<64x128xf32>
    %23 = arith.truncf %22 : vector<64x128xf32> to vector<64x128xbf16>
    %c0_7 = arith.constant 0 : index
    %c0_8 = arith.constant 0 : index
    %24 = vector.load %arg4[%c0_7, %c0_8] : memref<128x128xbf16, #tpu.memory_space<vmem>>, vector<128x128xbf16>
    %cst_9 = arith.constant dense<0.000000e+00> : vector<64x128xf32>
    %25 = tpu.matmul %23, %24, %cst_9 {dimension_numbers = #tpu.dot_dimension_numbers<[1], [0], [0], [1], [0, 0, 1, 1], [], []>} : vector<64x128xbf16>, vector<128x128xbf16>, vector<64x128xf32> -> vector<64x128xf32>
    %c0_10 = arith.constant 0 : index
    %c0_11 = arith.constant 0 : index
    %26 = vector.load %arg5[%c0_10, %c0_11] : memref<1x128xf32, #tpu.memory_space<vmem>>, vector<1x128xf32>
    %27 = vector.broadcast %26 : vector<1x128xf32> to vector<64x128xf32>
    %28 = arith.addf %25, %27 : vector<64x128xf32>
    %c0_12 = arith.constant 0 : index
    %c0_13 = arith.constant 0 : index
    %29 = vector.load %arg6[%c0_12, %c0_13] : memref<64x128xf32, #tpu.memory_space<vmem>>, vector<64x128xf32>
    tpu.vector_store %arg6[%c0_12, %c0_13], %28 {strides = array<i32>} : memref<64x128xf32, #tpu.memory_space<vmem>>, vector<64x128xf32>,
    return
  }
  func.func @transform_0(%arg0: i32) -> (i32, i32) {
    %c0_i32 = arith.constant 0 : i32
    %c0_i32_0 = arith.constant 0 : i32
    return %arg0, %c0_i32 : i32, i32
  }
  func.func @transform_1(%arg0: i32) -> (i32, i32) {
    %c0_i32 = arith.constant 0 : i32
    %c0_i32_0 = arith.constant 0 : i32
    %c0_i32_1 = arith.constant 0 : i32
    return %c0_i32, %c0_i32_0 : i32, i32
  }
  func.func @transform_2(%arg0: i32) -> (i32, i32) {
    %c0_i32 = arith.constant 0 : i32
    %c0_i32_0 = arith.constant 0 : i32
    %c0_i32_1 = arith.constant 0 : i32
    return %c0_i32, %c0_i32_0 : i32, i32
  }
  func.func @transform_3(%arg0: i32) -> (i32, i32) {
    %c0_i32 = arith.constant 0 : i32
    %c0_i32_0 = arith.constant 0 : i32
    %c0_i32_1 = arith.constant 0 : i32
    return %c0_i32, %c0_i32_0 : i32, i32
  }
  func.func @transform_4(%arg0: i32) -> (i32, i32) {
    %c0_i32 = arith.constant 0 : i32
    %c0_i32_0 = arith.constant 0 : i32
    %c0_i32_1 = arith.constant 0 : i32
    return %c0_i32, %c0_i32_0 : i32, i32
  }
  func.func @transform_5(%arg0: i32) -> (i32, i32) {
    %c0_i32 = arith.constant 0 : i32
    %c0_i32_0 = arith.constant 0 : i32
    return %arg0, %c0_i32 : i32, i32
  }
}

</mosaic_0001>

<bundles_post_ra>
// kernel: gru_net_forward.5
= control target key start
LH: loop header
LB: loop body
LE: loop exit
PB: predicated region body
PF: predicated region fallthrough
CT: control target
= control target key end

     0   :  { %v463_v1 = vmov 0   ;;  %v61_v37 = vlaneseq  ;;  %s679_s1 = inlined_call_operand.vmem [shape: bf16[128,384], index: 1, kind: input, shape index: {}]   ;;  %s680_s0 = inlined_call_operand.vmem [shape: f32[64,128], index: 0, kind: input, shape index: {}]   ;;  %s681_s2 = inlined_call_operand.vmem [shape: f32[1,384], index: 2, kind: input, shape index: {}]   ;;  %s682_s3 = inlined_call_operand.vmem [shape: f32[64,384], index: 3, kind: output, shape index: {}]  }
   0x1   :  { %v431_v0 = vld [vmem:[%s679_s1 + $0xac] ss:$12 sps:$4 sm:$0xff]   ;;  %236 = vmatprep.mubr.bf16.mxu0 %v463_v1  ;;  %v433_v2 = vld [vmem:[%s679_s1 + $0xa8] ss:$12 sps:$4 sm:$0xff]   ;;  %v436_v4 = vld [vmem:[%s679_s1 + $0x90] ss:$12 sps:$4 sm:$0xff]  }
   0x2   :  { %204 = vmatprep.subr.bf16.mxu0 %v431_v0  ;;  %v434_v3 = vld [vmem:[%s679_s1 + $0x94] ss:$12 sps:$4 sm:$0xff]   ;;  %v437_v5 = vld [vmem:[%s679_s1 + $0x7c] ss:$12 sps:$4 sm:$0xff]   ;;  %v439_v7 = vld [vmem:[%s679_s1 + $0x78] ss:$12 sps:$4 sm:$0xff]  }
   0x3   :  { %205 = vmatpush1.bf16.msra.mxu0 %v433_v2  ;;  %v440_v6 = vld [vmem:[%s679_s1 + $0xb0] ss:$12 sps:$4 sm:$0xff]   ;;  %v444_v8 = vld [vmem:[%s679_s1 + $0x98] ss:$12 sps:$4 sm:$0xff]   ;;  %v448_v10 = vld [vmem:[%s679_s1 + $0x80] ss:$12 sps:$4 sm:$0xff]  }
   0x4   :  { %206 = vmatprep.subr.bf16.mxu0 %v434_v3  ;;  %406 = vmatprep.subr.bf16.mxu1 %v440_v6  ;;  %v441_v9 = vld [vmem:[%s679_s1 + $0x64] ss:$12 sps:$4 sm:$0xff]   ;;  %v443_v11 = vld [vmem:[%s679_s1 + $0x60] ss:$12 sps:$4 sm:$0xff]   ;;  %v452_v13 = vld [vmem:[%s679_s1 + $0x68] ss:$12 sps:$4 sm:$0xff]  }
   0x5   :  { %407 = vmatpush3.bf16.msra.mxu1 %v440_v6  ;;  %v445_v12 = vld [vmem:[%s679_s1 + $0x4c] ss:$12 sps:$4 sm:$0xff]   ;;  %v447_v14 = vld [vmem:[%s679_s1 + $0x48] ss:$12 sps:$4 sm:$0xff]   ;;  %v456_v16 = vld [vmem:[%s679_s1 + $0x50] ss:$12 sps:$4 sm:$0xff]  }
   0x6   :  { %408 = vmatprep.subr.bf16.mxu1 %v444_v8  ;;  %v449_v15 = vld [vmem:[%s679_s1 + $0x34] ss:$12 sps:$4 sm:$0xff]   ;;  %v16_v18 = vld [vmem:[%s680_s0 + $0x8] sm:$0xff]  ;;  %v451_v19 = vld [vmem:[%s679_s1 + $0x30] ss:$12 sps:$4 sm:$0xff]   ;;  %v62_v38 = vshrl.u32 %v61_v37, 7 }
   0x7   :  { %207 = vmatpush1.bf16.msra.mxu0 %v436_v4  ;;  %v15_v17 = vld [vmem:[%s680_s0] sm:$0xff]  ;;  %v453_v21 = vld [vmem:[%s679_s1 + $0x1c] ss:$12 sps:$4 sm:$0xff]   ;;  %v17_v30 = vld [vmem:[%s680_s0 + $0x10] sm:$0xff] }
   0x8   :  { %208 = vmatprep.subr.bf16.mxu0 %v437_v5  ;;  %v23_v20 = vpack.c.bf16 %v16_v18, %v15_v17  ;;  %v460_v22 = vld [vmem:[%s679_s1 + $0x38] ss:$12 sps:$4 sm:$0xff]   ;;  %v461_v25 = vld [vmem:[%s679_s1 + $0x20] ss:$12 sps:$4 sm:$0xff]   ;;  %v462_v27 = vld [vmem:[%s679_s1 + $0x8] ss:$12 sps:$4 sm:$0xff]  }
   0x9   :  { %409 = vmatpush3.bf16.msra.mxu1 %v444_v8  ;;  %v455_v23 = vld [vmem:[%s679_s1 + $0x18] ss:$12 sps:$4 sm:$0xff]   ;;  %v459_v26 = vld [vmem:[%s679_s1] ss:$12 sps:$4 sm:$0xff]   ;;  %v21_v34 = vld [vmem:[%s680_s0 + $0x30] sm:$0xff]  ;;  %v63_v39 = vsub.s32 0, %v62_v38 }
   0xa   :  { %410 = vmatprep.subr.bf16.mxu1 %v448_v10  ;;  %422 = vmatprep.mubr.bf16.mxu1 %v23_v20  ;;  %v457_v24 = vld [vmem:[%s679_s1 + $0x4] ss:$12 sps:$4 sm:$0xff]   ;;  %v20_v29 = vld [vmem:[%s680_s0 + $0x28] sm:$0xff]  ;;  %v18_v31 = vld [vmem:[%s680_s0 + $0x18] sm:$0xff]  ;;  %v67_v41 = vsub.s32 1, %v62_v38  ;;  %v71_v43 = vsub.s32 2, %v62_v38 }
   0xb   :  { %209 = vmatpush1.bf16.msra.mxu0 %v439_v7  ;;  %v19_v28 = vld [vmem:[%s680_s0 + $0x20] sm:$0xff]  ;;  %v24_v33 = vpack.c.bf16 %v18_v31, %v17_v30  ;;  %v22_v35 = vld [vmem:[%s680_s0 + $0x38] sm:$0xff] }
   0xc   :  { %210 = vmatprep.subr.bf16.mxu0 %v441_v9  ;;  %v25_v32 = vpack.c.bf16 %v20_v29, %v19_v28  ;;  %v26_v36 = vpack.c.bf16 %v22_v35, %v21_v34  ;;  %v59_v40 = vld [vmem:[%s681_s2] sm:$0x7] }
   0xd   :  { %411 = vmatpush3.bf16.msra.mxu1 %v448_v10  ;;  %v587_v42 = vrot.slane %v59_v40, %v63_v39  ;;  %v589_v44 = vrot.slane %v59_v40, %v67_v41  ;;  %v72_v47 = vrot.slane %v59_v40, %v71_v43 }
   0xe   :  { %412 = vmatprep.subr.bf16.mxu1 %v452_v13 }
   0xf   :  { %211 = vmatpush1.bf16.msra.mxu0 %v443_v11 }
  0x10   :  { %212 = vmatprep.subr.bf16.mxu0 %v445_v12 }
  0x11   :  { %413 = vmatpush3.bf16.msra.mxu1 %v452_v13 }
  0x12   :  { %414 = vmatprep.subr.bf16.mxu1 %v456_v16 }
  0x13   :  { %213 = vmatpush1.bf16.msra.mxu0 %v447_v14 }
  0x14   :  { %214 = vmatprep.subr.bf16.mxu0 %v449_v15 }
  0x15   :  { %415 = vmatpush3.bf16.msra.mxu1 %v456_v16 }
  0x16   :  { %416 = vmatprep.subr.bf16.mxu1 %v460_v22 }
  0x17   :  { %215 = vmatpush1.bf16.msra.mxu0 %v451_v19 }
  0x18   :  { %216 = vmatprep.subr.bf16.mxu0 %v453_v21 }
  0x19   :  { %417 = vmatpush3.bf16.msra.mxu1 %v460_v22 }
  0x1a   :  { %418 = vmatprep.subr.bf16.mxu1 %v461_v25 }
  0x1b   :  { %217 = vmatpush1.bf16.msra.mxu0 %v455_v23 }
  0x1c   :  { %218 = vmatprep.subr.bf16.mxu0 %v457_v24 }
  0x1d   :  { %419 = vmatpush3.bf16.msra.mxu1 %v461_v25 }
  0x1e   :  { %420 = vmatprep.subr.bf16.mxu1 %v462_v27 }
  0x1f   :  { %219 = vmatpush1.bf16.msra.mxu0 %v459_v26 }
  0x21   :  { %421 = vmatpush3.bf16.msra.mxu1 %v462_v27 }
  0x22   :  { %237 = vmatmul.mubr.bf16.vlgmr.msra.gmra.mxu0 %v23_v20 }
  0x23   :  { %246 = vmatprep.mubr.bf16.mxu0 %v463_v1 }
  0x24   :  { %423 = vmatmul.mubr.bf16.vlgmr.msra.gmra.mxu1 %v24_v33 }
  0x25   :  { %426 = vmatprep.mubr.bf16.mxu1 %v25_v32 }
  0x2a   :  { %247 = vmatmul.mubr.bf16.gmra.mxu0 %v24_v33 }
  0x2b   :  { %256 = vmatprep.mubr.bf16.mxu0 %v463_v1 }
  0x2c   :  { %427 = vmatmul.mubr.bf16.gmra.mxu1 %v26_v36 }
  0x32   :  { %257 = vmatmul.mubr.bf16.gmra.mxu0 %v25_v32 }
  0x33   :  { %266 = vmatprep.mubr.bf16.mxu0 %v463_v1 }
  0x3a   :  { %267 = vmatmul.mubr.bf16.gmra.mxu0 %v26_v36 }
  0xe2   :  { %v238_v45 = vpop.f32.mrf.mxu0 }
  0xe3   :  { %v239_v46 = vadd.f32 %v238_v45, %v587_v42 }
  0xe4   :  { %v240_v48 = vpop.f32.mrf.mxu0  ;;  %v424_v51 = vpop.f32.mrf.mxu1 }
  0xe5   :  { %342 = vst [vmem:[%s682_s3] sm:$0xff] %v239_v46  ;;  %v241_v49 = vadd.f32 %v240_v48, %v589_v44  ;;  %v320_v53 = vadd.f32 %v424_v51, %v72_v47 }
  0xe6   :  { %v242_v50 = vpop.f32.mrf.mxu0  ;;  %v311_v55 = vpop.f32.mrf.mxu1 }
  0xe7   :  { %343 = vst [vmem:[%s682_s3 + $0x8] sm:$0xff] %v241_v49  ;;  %v243_v52 = vadd.f32 %v242_v50, %v587_v42  ;;  %350 = vst [vmem:[%s682_s3 + $0x40] sm:$0xff] %v320_v53  ;;  %v312_v57 = vadd.f32 %v311_v55, %v72_v47 }
  0xe8   :  { %v244_v54 = vpop.f32.mrf.mxu0  ;;  %v425_v59 = vpop.f32.mrf.mxu1 }
  0xe9   :  { %345 = vst [vmem:[%s682_s3 + $0x18] sm:$0xff] %v243_v52  ;;  %v245_v56 = vadd.f32 %v244_v54, %v589_v44  ;;  %344 = vst [vmem:[%s682_s3 + $0x10] sm:$0xff] %v312_v57  ;;  %v323_v61 = vadd.f32 %v425_v59, %v72_v47 }
  0xea   :  { %v248_v58 = vpop.f32.mrf.mxu0  ;;  %v314_v63 = vpop.f32.mrf.mxu1 }
  0xeb   :  { %346 = vst [vmem:[%s682_s3 + $0x20] sm:$0xff] %v245_v56  ;;  %v249_v60 = vadd.f32 %v248_v58, %v587_v42  ;;  %353 = vst [vmem:[%s682_s3 + $0x58] sm:$0xff] %v323_v61  ;;  %v315_v1 = vadd.f32 %v314_v63, %v72_v47 }
  0xec   :  { %v250_v62 = vpop.f32.mrf.mxu0  ;;  %v428_v3 = vpop.f32.mrf.mxu1 }
  0xed   :  { %348 = vst [vmem:[%s682_s3 + $0x30] sm:$0xff] %v249_v60  ;;  %v251_v0 = vadd.f32 %v250_v62, %v589_v44  ;;  %347 = vst [vmem:[%s682_s3 + $0x28] sm:$0xff] %v315_v1  ;;  %v336_v5 = vadd.f32 %v428_v3, %v72_v47 }
  0xee   :  { %v252_v2 = vpop.f32.mrf.mxu0  ;;  %v327_v7 = vpop.f32.mrf.mxu1 }
  0xef   :  { %349 = vst [vmem:[%s682_s3 + $0x38] sm:$0xff] %v251_v0  ;;  %v253_v4 = vadd.f32 %v252_v2, %v587_v42  ;;  %362 = vst [vmem:[%s682_s3 + $0xa0] sm:$0xff] %v336_v5  ;;  %v328_v9 = vadd.f32 %v327_v7, %v72_v47 }
  0xf0   :  { %v254_v6 = vpop.f32.mrf.mxu0  ;;  %v429_v11 = vpop.f32.mrf.mxu1 }
  0xf1   :  { %351 = vst [vmem:[%s682_s3 + $0x48] sm:$0xff] %v253_v4  ;;  %v255_v8 = vadd.f32 %v254_v6, %v589_v44  ;;  %356 = vst [vmem:[%s682_s3 + $0x70] sm:$0xff] %v328_v9  ;;  %v339_v13 = vadd.f32 %v429_v11, %v72_v47 }
  0xf2   :  { %v258_v10 = vpop.f32.mrf.mxu0  ;;  %v330_v15 = vpop.f32.mrf.mxu1 }
  0xf3   :  { %352 = vst [vmem:[%s682_s3 + $0x50] sm:$0xff] %v255_v8  ;;  %v259_v12 = vadd.f32 %v258_v10, %v587_v42  ;;  %365 = vst [vmem:[%s682_s3 + $0xb8] sm:$0xff] %v339_v13  ;;  %v331_v17 = vadd.f32 %v330_v15, %v72_v47 }
  0xf4   :  { %v260_v14 = vpop.f32.mrf.mxu0 }
  0xf5   :  { %354 = vst [vmem:[%s682_s3 + $0x60] sm:$0xff] %v259_v12  ;;  %v261_v16 = vadd.f32 %v260_v14, %v589_v44  ;;  %359 = vst [vmem:[%s682_s3 + $0x88] sm:$0xff] %v331_v17 }
  0xf6   :  { %v262_v18 = vpop.f32.mrf.mxu0 }
  0xf7   :  { %355 = vst [vmem:[%s682_s3 + $0x68] sm:$0xff] %v261_v16  ;;  %v263_v19 = vadd.f32 %v262_v18, %v587_v42 }
  0xf8   :  { %v264_v20 = vpop.f32.mrf.mxu0 }
  0xf9   :  { %357 = vst [vmem:[%s682_s3 + $0x78] sm:$0xff] %v263_v19  ;;  %v265_v21 = vadd.f32 %v264_v20, %v589_v44 }
  0xfa   :  { %v268_v22 = vpop.f32.mrf.mxu0 }
  0xfb   :  { %358 = vst [vmem:[%s682_s3 + $0x80] sm:$0xff] %v265_v21  ;;  %v269_v23 = vadd.f32 %v268_v22, %v587_v42 }
  0xfc   :  { %v270_v24 = vpop.f32.mrf.mxu0 }
  0xfd   :  { %360 = vst [vmem:[%s682_s3 + $0x90] sm:$0xff] %v269_v23  ;;  %v271_v25 = vadd.f32 %v270_v24, %v589_v44 }
  0xfe   :  { %v272_v26 = vpop.f32.mrf.mxu0 }
  0xff   :  { %361 = vst [vmem:[%s682_s3 + $0x98] sm:$0xff] %v271_v25  ;;  %v273_v27 = vadd.f32 %v272_v26, %v587_v42 }
 0x100   :  { %v274_v28 = vpop.f32.mrf.mxu0 }
 0x101   :  { %363 = vst [vmem:[%s682_s3 + $0xa8] sm:$0xff] %v273_v27  ;;  %v275_v29 = vadd.f32 %v274_v28, %v589_v44 }
 0x103   :  { %364 = vst [vmem:[%s682_s3 + $0xb0] sm:$0xff] %v275_v29 }

// kernel: gru_net_forward.9
= control target key start
LH: loop header
LB: loop body
LE: loop exit
PB: predicated region body
PF: predicated region fallthrough
CT: control target
= control target key end

     0   :  { %s900_s1 = inlined_call_operand.vmem [shape: bf16[128,128], index: 1, kind: input, shape index: {}]   ;;  %s901_s0 = inlined_call_operand.vmem [shape: f32[64,128], index: 0, kind: input, shape index: {}]   ;;  %s902_s3 = inlined_call_operand.vmem [shape: bf16[128,128], index: 3, kind: input, shape index: {}]   ;;  %s903_s2 = inlined_call_operand.vmem [shape: f32[1,128], index: 2, kind: input, shape index: {}]   ;;  %s904_s4 = inlined_call_operand.vmem [shape: f32[1,128], index: 4, kind: input, shape index: {}]   ;;  %s905_s5 = inlined_call_operand.vmem [shape: f32[64,128], index: 5, kind: output, shape index: {}]  }
   0x1   :  { %v571_v0 = vld [vmem:[%s900_s1 + $0x38] sm:$0xff]   ;;  %v572_v1 = vld [vmem:[%s900_s1 + $0x30] sm:$0xff]   ;;  %v573_v2 = vld [vmem:[%s900_s1 + $0x28] sm:$0xff]  }
   0x2   :  { %523 = vmatprep.subr.bf16.mxu0 %v571_v0  ;;  %v574_v3 = vld [vmem:[%s900_s1 + $0x20] sm:$0xff]   ;;  %v22_v5 = vld [vmem:[%s901_s0 + $0x8] sm:$0xff]  ;;  %v575_v7 = vld [vmem:[%s900_s1 + $0x18] sm:$0xff]  }
   0x3   :  { %524 = vmatpush3.bf16.msra.mxu0 %v571_v0  ;;  %v21_v4 = vld [vmem:[%s901_s0] sm:$0xff]  ;;  %v576_v8 = vld [vmem:[%s900_s1 + $0x10] sm:$0xff]   ;;  %v577_v9 = vld [vmem:[%s900_s1 + $0x8] sm:$0xff]  }
   0x4   :  { %525 = vmatprep.subr.bf16.mxu0 %v572_v1  ;;  %v29_v6 = vpack.c.bf16 %v22_v5, %v21_v4  ;;  %v578_v10 = vld [vmem:[%s900_s1] sm:$0xff]   ;;  %v23_v11 = vld [vmem:[%s901_s0 + $0x10] sm:$0xff]  ;;  %v24_v12 = vld [vmem:[%s901_s0 + $0x18] sm:$0xff] }
   0x5   :  { %v25_v13 = vld [vmem:[%s901_s0 + $0x20] sm:$0xff]  ;;  %v26_v14 = vld [vmem:[%s901_s0 + $0x28] sm:$0xff]  ;;  %v30_v15 = vpack.c.bf16 %v24_v12, %v23_v11  ;;  %v27_v17 = vld [vmem:[%s901_s0 + $0x30] sm:$0xff] }
   0x6   :  { %539 = vmatprep.mubr.bf16.mxu0 %v29_v6  ;;  %v31_v16 = vpack.c.bf16 %v26_v14, %v25_v13  ;;  %v28_v18 = vld [vmem:[%s901_s0 + $0x38] sm:$0xff]  ;;  %v580_v21 = vld [vmem:[%s902_s3 + $0x30] sm:$0xff]   ;;  %v581_v22 = vld [vmem:[%s902_s3 + $0x28] sm:$0xff]  }
   0x7   :  { %526 = vmatpush3.bf16.msra.mxu0 %v572_v1  ;;  %v32_v19 = vpack.c.bf16 %v28_v18, %v27_v17  ;;  %v579_v20 = vld [vmem:[%s902_s3 + $0x38] sm:$0xff]   ;;  %v582_v23 = vld [vmem:[%s902_s3 + $0x20] sm:$0xff]   ;;  %v584_v25 = vld [vmem:[%s902_s3 + $0x10] sm:$0xff]  }
   0x8   :  { %527 = vmatprep.subr.bf16.mxu0 %v573_v2  ;;  %547 = vmatprep.subr.bf16.mxu1 %v579_v20  ;;  %v583_v24 = vld [vmem:[%s902_s3 + $0x18] sm:$0xff]   ;;  %v585_v26 = vld [vmem:[%s902_s3 + $0x8] sm:$0xff]   ;;  %v586_v27 = vld [vmem:[%s902_s3] sm:$0xff]  }
   0x9   :  { %548 = vmatpush3.bf16.msra.mxu1 %v579_v20  ;;  %v481_v28 = vld [vmem:[%s903_s2] ss:$0 sm:$0xff] }
   0xa   :  { %549 = vmatprep.subr.bf16.mxu1 %v580_v21 }
   0xb   :  { %528 = vmatpush3.bf16.msra.mxu0 %v573_v2 }
   0xc   :  { %529 = vmatprep.subr.bf16.mxu0 %v574_v3 }
   0xd   :  { %550 = vmatpush3.bf16.msra.mxu1 %v580_v21 }
   0xe   :  { %551 = vmatprep.subr.bf16.mxu1 %v581_v22 }
   0xf   :  { %530 = vmatpush3.bf16.msra.mxu0 %v574_v3 }
  0x10   :  { %531 = vmatprep.subr.bf16.mxu0 %v575_v7 }
  0x11   :  { %552 = vmatpush3.bf16.msra.mxu1 %v581_v22 }
  0x12   :  { %553 = vmatprep.subr.bf16.mxu1 %v582_v23 }
  0x13   :  { %532 = vmatpush3.bf16.msra.mxu0 %v575_v7 }
  0x14   :  { %533 = vmatprep.subr.bf16.mxu0 %v576_v8 }
  0x15   :  { %554 = vmatpush3.bf16.msra.mxu1 %v582_v23 }
  0x16   :  { %555 = vmatprep.subr.bf16.mxu1 %v583_v24 }
  0x17   :  { %534 = vmatpush3.bf16.msra.mxu0 %v576_v8 }
  0x18   :  { %535 = vmatprep.subr.bf16.mxu0 %v577_v9 }
  0x19   :  { %556 = vmatpush3.bf16.msra.mxu1 %v583_v24 }
  0x1a   :  { %557 = vmatprep.subr.bf16.mxu1 %v584_v25 }
  0x1b   :  { %536 = vmatpush3.bf16.msra.mxu0 %v577_v9 }
  0x1c   :  { %537 = vmatprep.subr.bf16.mxu0 %v578_v10 }
  0x1d   :  { %558 = vmatpush3.bf16.msra.mxu1 %v584_v25 }
  0x1e   :  { %559 = vmatprep.subr.bf16.mxu1 %v585_v26 }
  0x1f   :  { %538 = vmatpush3.bf16.msra.mxu0 %v578_v10 }
  0x21   :  { %560 = vmatpush3.bf16.msra.mxu1 %v585_v26 }
  0x22   :  { %540 = vmatmul.mubr.bf16.vlgmr.msra.gmra.mxu0 %v30_v15  ;;  %561 = vmatprep.subr.bf16.mxu1 %v586_v27 }
  0x23   :  { %543 = vmatprep.mubr.bf16.mxu0 %v31_v16 }
  0x25   :  { %562 = vmatpush3.bf16.msra.mxu1 %v586_v27 }
  0x2a   :  { %544 = vmatmul.mubr.bf16.gmra.mxu0 %v32_v19 }
  0xe2   :  { %v541_v29 = vpop.f32.mrf.mxu0 }
  0xe3   :  { %v740_v30 = vadd.f32 %v541_v29, %v481_v28 }
  0xe4   :  { %v138_v31 = vpop.f32.mrf.mxu0 }
  0xe5   :  { %v195_v32 = vand.u32 2147483647, %v740_v30  ;;  %v743_v33 = vadd.f32 %v481_v28, %v138_v31  ;;  %v171_v23 = vmax.f32 %v740_v30, 0.0  ;;  %vm179_vm2 = vcmp.ne.f32.partialorder %v740_v30, %v740_v30 }
  0xe6   :  { %v542_v34 = vpop.f32.mrf.mxu0 }
  0xe7   :  { %v203_v35 = vsub.f32 0.0, %v195_v32  ;;  %v193_v36 = vand.u32 2147483647, %v743_v33  ;;  %v746_v37 = vadd.f32 %v542_v34, %v481_v28  ;;  %v169_v24 = vmax.f32 %v743_v33, 0.0 }
  0xe8   :  { %v141_v38 = vpop.f32.mrf.mxu0  ;;  %vm177_vm0 = vcmp.ne.f32.partialorder %v743_v33, %v743_v33 }
  0xe9   :  { %v213_v39 = vmul.f32 1.442695, %v203_v35  ;;  %v201_v40 = vsub.f32 0.0, %v193_v36  ;;  %v748_v41 = vadd.f32 %v481_v28, %v141_v38  ;;  %v196_v42 = vand.u32 2147483647, %v746_v37 }
  0xea   :  { %v545_v43 = vpop.f32.mrf.mxu0  ;;  %v172_v27 = vmax.f32 %v746_v37, 0.0  ;;  %vm180_vm3 = vcmp.ne.f32.partialorder %v746_v37, %v746_v37 }
  0xeb   :  { %587 = vpow2.f32 %v213_v39  ;;  %v209_v44 = vmul.f32 1.442695, %v201_v40  ;;  %v204_v45 = vsub.f32 0.0, %v196_v42  ;;  %v194_v46 = vand.u32 2147483647, %v748_v41 }
  0xec   :  { %v752_v47 = vadd.f32 %v545_v43, %v481_v28  ;;  %v154_v48 = vpop.f32.mrf.mxu0  ;;  %vm178_vm5 = vcmp.ne.f32.partialorder %v748_v41, %v748_v41 }
  0xed   :  { %589 = vpow2.f32 %v209_v44  ;;  %v754_v49 = vadd.f32 %v481_v28, %v154_v48  ;;  %v215_v50 = vmul.f32 1.442695, %v204_v45  ;;  %v202_v51 = vsub.f32 0.0, %v194_v46 }
  0xee   :  { %v546_v52 = vpop.f32.mrf.mxu0  ;;  %v199_v53 = vand.u32 2147483647, %v752_v47  ;;  %vm183_vm8 = vcmp.ne.f32.partialorder %v752_v47, %v752_v47 }
  0xef   :  { %v197_v54 = vand.u32 2147483647, %v754_v49  ;;  %591 = vpow2.f32 %v215_v50  ;;  %v211_v55 = vmul.f32 1.442695, %v202_v51  ;;  %v758_v56 = vadd.f32 %v546_v52, %v481_v28 }
  0xf0   :  { %v157_v57 = vpop.f32.mrf.mxu0  ;;  %v207_v58 = vsub.f32 0.0, %v199_v53  ;;  %vm181_vm11 = vcmp.ne.f32.partialorder %v754_v49, %v754_v49 }
  0xf1   :  { %v205_v59 = vsub.f32 0.0, %v197_v54  ;;  %v760_v60 = vadd.f32 %v481_v28, %v157_v57  ;;  %593 = vpow2.f32 %v211_v55  ;;  %v200_v61 = vand.u32 2147483647, %v758_v56 }
  0xf2   :  { %v221_v62 = vmul.f32 1.442695, %v207_v58  ;;  %v170_v28 = vmax.f32 %v748_v41, 0.0  ;;  %v175_v54 = vmax.f32 %v752_v47, 0.0  ;;  %v173_v55 = vmax.f32 %v754_v49, 0.0 }
  0xf3   :  { %v217_v63 = vmul.f32 1.442695, %v205_v59  ;;  %v208_v0 = vsub.f32 0.0, %v200_v61  ;;  %v198_v1 = vand.u32 2147483647, %v760_v60  ;;  %vm184_vm14 = vcmp.ne.f32.partialorder %v758_v56, %v758_v56 }
  0xf4   :  { %595 = vpow2.f32 %v221_v62  ;;  %vm182_vm15 = vcmp.ne.f32.partialorder %v760_v60, %v760_v60 }
  0xf5   :  { %597 = vpow2.f32 %v217_v63  ;;  %v223_v2 = vmul.f32 1.442695, %v208_v0  ;;  %v206_v3 = vsub.f32 0.0, %v198_v1 }
  0xf7   :  { %599 = vpow2.f32 %v223_v2  ;;  %v219_v5 = vmul.f32 1.442695, %v206_v3 }
  0xf8   :  { %v588_v4 = vpop.eup %587 }
  0xf9   :  { %v243_v6 = vadd.f32 1.0, %v588_v4  ;;  %601 = vpow2.f32 %v219_v5  ;;  %v246_v13 = vmul.f32 -0.5, %v588_v4  ;;  %v249_v18 = vand.u32 2147483647, %v588_v4 }
  0xfa   :  { %v590_v7 = vpop.eup %589 }
  0xfb   :  { %603 = vlog2.f32 %v243_v6  ;;  %v225_v8 = vadd.f32 1.0, %v590_v7  ;;  %v228_v15 = vmul.f32 -0.5, %v590_v7  ;;  %v247_v22 = vadd.f32 1.0, %v246_v13 }
  0xfc   :  { %v764_v9 = vpop.eup %591  ;;  %vm785_vm1 = vcmp.lt.f32.partialorder %v249_v18, 0.0004427343  ;;  %v231_v35 = vand.u32 2147483647, %v590_v7 }
  0xfd   :  { %605 = vlog2.f32 %v225_v8  ;;  %v252_v10 = vadd.f32 1.0, %v764_v9  ;;  %v255_v19 = vmul.f32 -0.5, %v764_v9  ;;  %v229_v25 = vadd.f32 1.0, %v228_v15 }
  0xfe   :  { %v594_v11 = vpop.eup %593  ;;  %v248_v40 = vmul.f32 %v588_v4, %v247_v22  ;;  %v258_v45 = vand.u32 2147483647, %v764_v9  ;;  %vm232_vm4 = vcmp.lt.f32.partialorder %v231_v35, 0.0004427343 }
  0xff   :  { %607 = vlog2.f32 %v252_v10  ;;  %v234_v12 = vadd.f32 1.0, %v594_v11  ;;  %v237_v29 = vmul.f32 -0.5, %v594_v11  ;;  %v256_v36 = vadd.f32 1.0, %v255_v19 }
 0x100   :  { %v230_v44 = vmul.f32 %v590_v7, %v229_v25  ;;  %v240_v46 = vand.u32 2147483647, %v594_v11  ;;  %vm259_vm6 = vcmp.lt.f32.partialorder %v258_v45, 0.0004427343 }
 0x101   :  { %v767_v14 = vpop.eup %595  ;;  %609 = vlog2.f32 %v234_v12  ;;  %v238_v51 = vadd.f32 1.0, %v237_v29  ;;  %v257_v53 = vmul.f32 %v764_v9, %v256_v36 }
 0x102   :  { %v769_v16 = vpop.eup %597  ;;  %v279_v17 = vadd.f32 1.0, %v767_v14  ;;  %v282_v42 = vmul.f32 -0.5, %v767_v14  ;;  %v285_v61 = vand.u32 2147483647, %v767_v14  ;;  %vm807_vm7 = vcmp.lt.f32.partialorder %v240_v46, 0.0004427343 }
 0x103   :  { %v261_v20 = vadd.f32 1.0, %v769_v16  ;;  %v264_v52 = vmul.f32 -0.5, %v769_v16  ;;  %v267_v62 = vand.u32 2147483647, %v769_v16  ;;  %v239_v4 = vmul.f32 %v594_v11, %v238_v51 }
 0x104   :  { %v774_v21 = vpop.eup %599  ;;  %611 = vlog2.f32 %v279_v17  ;;  %v283_v59 = vadd.f32 1.0, %v282_v42  ;;  %vm819_vm9 = vcmp.lt.f32.partialorder %v285_v61, 0.0004427343  ;;  %v174_v51 = vmax.f32 %v760_v60, 0.0 }
 0x105   :  { %613 = vlog2.f32 %v261_v20  ;;  %v288_v31 = vadd.f32 1.0, %v774_v21  ;;  %v291_v2 = vmul.f32 -0.5, %v774_v21  ;;  %v265_v6 = vadd.f32 1.0, %v264_v52 }
 0x106   :  { %v778_v26 = vpop.eup %601  ;;  %v284_v11 = vmul.f32 %v767_v14, %v283_v59  ;;  %vm823_vm10 = vcmp.lt.f32.partialorder %v267_v62, 0.0004427343  ;;  %v294_v14 = vand.u32 2147483647, %v774_v21 }
 0x107   :  { %v270_v38 = vadd.f32 1.0, %v778_v26  ;;  %615 = vlog2.f32 %v288_v31  ;;  %v273_v10 = vmul.f32 -0.5, %v778_v26  ;;  %v292_v20 = vadd.f32 1.0, %v291_v2 }
 0x108   :  { %v604_v32 = vpop.eup %603  ;;  %v266_v29 = vmul.f32 %v769_v16, %v265_v6  ;;  %v276_v35 = vand.u32 2147483647, %v778_v26  ;;  %vm295_vm12 = vcmp.lt.f32.partialorder %v294_v14, 0.0004427343 }
 0x109   :  { %v245_v39 = vmul.f32 0.6931472, %v604_v32  ;;  %617 = vlog2.f32 %v270_v38  ;;  %v274_v31 = vadd.f32 1.0, %v273_v10 }
 0x10a   :  { %v606_v43 = vpop.eup %605  ;;  %vm277_vm13 = vcmp.lt.f32.partialorder %v276_v35, 0.0004427343 }
 0x10b   :  { %v251_v48 = vsel %vm785_vm1, %v248_v40, %v245_v39  ;;  %v227_v50 = vmul.f32 0.6931472, %v606_v43  ;;  %v176_v40 = vmax.f32 %v758_v56, 0.0  ;;  %v293_v43 = vmul.f32 %v774_v21, %v292_v20 }
 0x10c   :  { %v608_v57 = vpop.eup %607  ;;  %v299_v63 = vadd.f32 %v251_v48, %v171_v23  ;;  %v275_v46 = vmul.f32 %v778_v26, %v274_v31 }
 0x10d   :  { %v233_v58 = vsel %vm232_vm4, %v230_v44, %v227_v50  ;;  %v254_v1 = vmul.f32 0.6931472, %v608_v57 }
 0x10e   :  { %v297_v0 = vadd.f32 %v233_v58, %v169_v24  ;;  %v610_v3 = vpop.eup %609  ;;  %v307_v18 = vsel %vm179_vm2, %v740_v30, %v299_v63 }
 0x10f   :  { %v260_v8 = vsel %vm259_vm6, %v257_v53, %v254_v1  ;;  %v236_v9 = vmul.f32 0.6931472, %v610_v3 }
 0x110   :  { %v305_v7 = vsel %vm177_vm0, %v743_v33, %v297_v0  ;;  %v300_v12 = vadd.f32 %v260_v8, %v172_v27 }
 0x111   :  { %v612_v17 = vpop.eup %611  ;;  %v242_v19 = vsel %vm807_vm7, %v239_v4, %v236_v9  ;;  %619 = vtanh.f32 %v305_v7 }
 0x112   :  { %v614_v22 = vpop.eup %613  ;;  %v308_v23 = vsel %vm180_vm3, %v746_v37, %v300_v12  ;;  %v298_v24 = vadd.f32 %v242_v19, %v170_v28  ;;  %v281_v25 = vmul.f32 0.6931472, %v612_v17 }
 0x113   :  { %621 = vtanh.f32 %v308_v23  ;;  %v263_v27 = vmul.f32 0.6931472, %v614_v22 }
 0x114   :  { %623 = vtanh.f32 %v307_v18  ;;  %v306_v32 = vsel %vm178_vm5, %v748_v41, %v298_v24  ;;  %v287_v34 = vsel %vm819_vm9, %v284_v11, %v281_v25  ;;  %v616_v36 = vpop.eup %615 }
 0x115   :  { %625 = vtanh.f32 %v306_v32  ;;  %v303_v28 = vadd.f32 %v287_v34, %v175_v54  ;;  %v269_v16 = vsel %vm823_vm10, %v266_v29, %v263_v27  ;;  %v290_v42 = vmul.f32 0.6931472, %v616_v36 }
 0x116   :  { %v618_v38 = vpop.eup %617  ;;  %v301_v39 = vadd.f32 %v269_v16, %v173_v55 }
 0x117   :  { %v311_v44 = vsel %vm183_vm8, %v752_v47, %v303_v28  ;;  %v272_v45 = vmul.f32 0.6931472, %v618_v38  ;;  %v296_v50 = vsel %vm295_vm12, %v293_v43, %v290_v42 }
 0x118   :  { %v309_v48 = vsel %vm181_vm11, %v754_v49, %v301_v39  ;;  %v304_v52 = vadd.f32 %v296_v50, %v176_v40  ;;  %627 = vtanh.f32 %v311_v44 }
 0x119   :  { %v278_v53 = vsel %vm277_vm13, %v275_v46, %v272_v45  ;;  %629 = vtanh.f32 %v309_v48 }
 0x11a   :  { %v302_v21 = vadd.f32 %v278_v53, %v174_v51  ;;  %v312_v54 = vsel %vm184_vm14, %v758_v56, %v304_v52 }
 0x11b   :  { %631 = vtanh.f32 %v312_v54 }
 0x11c   :  { %v310_v26 = vsel %vm182_vm15, %v760_v60, %v302_v21 }
 0x11d   :  { %633 = vtanh.f32 %v310_v26 }
 0x11e   :  { %v620_v55 = vpop.eup %619 }
 0x11f   :  { %v321_v62 = vmul.f32 %v620_v55, %v743_v33 }
 0x120   :  { %v622_v57 = vpop.eup %621 }
 0x121   :  { %v624_v58 = vpop.eup %623  ;;  %v324_v61 = vmul.f32 %v622_v57, %v746_v37 }
 0x122   :  { %v626_v59 = vpop.eup %625  ;;  %v323_v0 = vmul.f32 %v624_v58, %v740_v30  ;;  %v490_v30 = vld [vmem:[%s904_s4] ss:$0 sm:$0xff] }
 0x123   :  { %v322_v63 = vmul.f32 %v626_v59, %v748_v41 }
 0x124   :  { %v330_v2 = vpack.c.bf16 %v324_v61, %v323_v0 }
 0x125   :  { %v329_v1 = vpack.c.bf16 %v322_v63, %v321_v62  ;;  %v628_v3 = vpop.eup %627 }
 0x126   :  { %v630_v4 = vpop.eup %629  ;;  %v327_v33 = vmul.f32 %v628_v3, %v752_v47 }
 0x127   :  { %563 = vmatprep.mubr.bf16.mxu1 %v329_v1  ;;  %v325_v8 = vmul.f32 %v630_v4, %v754_v49 }
 0x128   :  { %564 = vmatmul.mubr.bf16.vlgmr.msra.gmra.mxu1 %v330_v2  ;;  %v632_v5 = vpop.eup %631 }
 0x129   :  { %v328_v7 = vmul.f32 %v632_v5, %v758_v56 }
 0x12a   :  { %v634_v6 = vpop.eup %633 }
 0x12b   :  { %v326_v37 = vmul.f32 %v634_v6, %v760_v60  ;;  %v332_v41 = vpack.c.bf16 %v328_v7, %v327_v33 }
 0x12d   :  { %v331_v9 = vpack.c.bf16 %v326_v37, %v325_v8 }
 0x12f   :  { %567 = vmatprep.mubr.bf16.mxu1 %v331_v9 }
 0x130   :  { %568 = vmatmul.mubr.bf16.gmra.mxu1 %v332_v41 }
 0x1e8   :  { %v565_v10 = vpop.f32.mrf.mxu1 }
 0x1e9   :  { %v447_v12 = vadd.f32 %v565_v10, %v490_v30 }
 0x1ea   :  { %v438_v11 = vpop.f32.mrf.mxu1 }
 0x1eb   :  { %471 = vst [vmem:[%s905_s5 + $0x10] sm:$0xff] %v447_v12  ;;  %v439_v49 = vadd.f32 %v490_v30, %v438_v11 }
 0x1ec   :  { %v566_v56 = vpop.f32.mrf.mxu1 }
 0x1ed   :  { %469 = vst [vmem:[%s905_s5] sm:$0xff] %v439_v49  ;;  %v450_v47 = vadd.f32 %v566_v56, %v490_v30 }
 0x1ee   :  { %v441_v60 = vpop.f32.mrf.mxu1 }
 0x1ef   :  { %472 = vst [vmem:[%s905_s5 + $0x18] sm:$0xff] %v450_v47  ;;  %v442_v13 = vadd.f32 %v490_v30, %v441_v60 }
 0x1f0   :  { %v569_v15 = vpop.f32.mrf.mxu1 }
 0x1f1   :  { %470 = vst [vmem:[%s905_s5 + $0x8] sm:$0xff] %v442_v13  ;;  %v463_v17 = vadd.f32 %v569_v15, %v490_v30 }
 0x1f2   :  { %v454_v18 = vpop.f32.mrf.mxu1 }
 0x1f3   :  { %475 = vst [vmem:[%s905_s5 + $0x30] sm:$0xff] %v463_v17  ;;  %v455_v19 = vadd.f32 %v490_v30, %v454_v18 }
 0x1f4   :  { %v570_v20 = vpop.f32.mrf.mxu1 }
 0x1f5   :  { %473 = vst [vmem:[%s905_s5 + $0x20] sm:$0xff] %v455_v19  ;;  %v466_v14 = vadd.f32 %v570_v20, %v490_v30 }
 0x1f6   :  { %v457_v22 = vpop.f32.mrf.mxu1 }
 0x1f7   :  { %476 = vst [vmem:[%s905_s5 + $0x38] sm:$0xff] %v466_v14  ;;  %v458_v23 = vadd.f32 %v490_v30, %v457_v22 }
 0x1f9   :  { %474 = vst [vmem:[%s905_s5 + $0x28] sm:$0xff] %v458_v23 }

// kernel: gru_net_forward.6
= control target key start
LH: loop header
LB: loop body
LE: loop exit
PB: predicated region body
PF: predicated region fallthrough
CT: control target
= control target key end

     0   :  { %v1501_v1 = vmov 0.0   ;;  %v1502_v2 = vmov 0   ;;  %vm1503_vm0 = vmmov 0   ;;  %v1504_v25 = vmov 0.0|0.0   ;;  %s2114_s1 = inlined_call_operand.vmem [shape: bf16[128,384], index: 1, kind: input, shape index: {}]   ;;  %s2115_s2 = inlined_call_operand.vmem [shape: f32[1,384], index: 2, kind: input, shape index: {}]   ;;  %s2116_s0 = inlined_call_operand.vmem [shape: f32[8,8,384], index: 0, kind: input, shape index: {}]   ;;  %s2117_s3 = inlined_call_operand.vmem [shape: f32[8,8,128], index: 3, kind: output, shape index: {}]  }
   0x1   :  { %v1528_v0 = vld [vmem:[%s2114_s1 + $0xac] ss:$12 sps:$4 sm:$0xff]   ;;  %1213 = vmatprep.subr.bf16.mxu1 %v1501_v1  ;;  %234 = vmatprep.mubr.bf16.mxu0 %v1502_v2  ;;  %v1535_v3 = vld [vmem:[%s2114_s1 + $0xa8] ss:$12 sps:$4 sm:$0xff]   ;;  %v1549_v5 = vld [vmem:[%s2114_s1 + $0x90] ss:$12 sps:$4 sm:$0xff]   ;;  %v59_v27 = vlaneseq }
   0x2   :  { %1229 = vmatprep.mubr.msk.bf16.mxu1 %vm1503_vm0, %v1501_v1  ;;  %202 = vmatprep.subr.bf16.mxu0 %v1528_v0  ;;  %v1543_v4 = vld [vmem:[%s2114_s1 + $0x94] ss:$12 sps:$4 sm:$0xff]   ;;  %v1555_v6 = vld [vmem:[%s2114_s1 + $0x7c] ss:$12 sps:$4 sm:$0xff]   ;;  %v1561_v7 = vld [vmem:[%s2114_s1 + $0x78] ss:$12 sps:$4 sm:$0xff]  }
   0x3   :  { %203 = vmatpush1.bf16.msra.mxu0 %v1535_v3  ;;  %v1567_v8 = vld [vmem:[%s2114_s1 + $0x64] ss:$12 sps:$4 sm:$0xff]   ;;  %v1572_v9 = vld [vmem:[%s2114_s1 + $0x60] ss:$12 sps:$4 sm:$0xff]   ;;  %v1597_v13 = vld [vmem:[%s2114_s1 + $0x48] ss:$12 sps:$4 sm:$0xff]  }
   0x4   :  { %204 = vmatprep.subr.bf16.mxu0 %v1543_v4  ;;  %v1578_v10 = vld [vmem:[%s2114_s1 + $0xb0] ss:$12 sps:$4 sm:$0xff]   ;;  %v1584_v11 = vld [vmem:[%s2114_s1 + $0x4c] ss:$12 sps:$4 sm:$0xff]   ;;  %v1603_v14 = vld [vmem:[%s2114_s1 + $0x34] ss:$12 sps:$4 sm:$0xff]  }
   0x5   :  { %1214 = vmatpush3.bf16.msra.mxu1 %v1578_v10  ;;  %v1590_v12 = vld [vmem:[%s2114_s1 + $0x98] ss:$12 sps:$4 sm:$0xff]   ;;  %v1609_v15 = vld [vmem:[%s2114_s1 + $0x80] ss:$12 sps:$4 sm:$0xff]   ;;  %v1616_v16 = vld [vmem:[%s2114_s1 + $0x30] ss:$12 sps:$4 sm:$0xff]  }
   0x6   :  { %1215 = vmatprep.subr.bf16.mxu1 %v1501_v1  ;;  %v1622_v17 = vld [vmem:[%s2114_s1 + $0x1c] ss:$12 sps:$4 sm:$0xff]   ;;  %v1635_v19 = vld [vmem:[%s2114_s1 + $0x18] ss:$12 sps:$4 sm:$0xff]   ;;  %v1654_v22 = vld [vmem:[%s2114_s1] ss:$12 sps:$4 sm:$0xff]  }
   0x7   :  { %205 = vmatpush1.bf16.msra.mxu0 %v1549_v5  ;;  %v1628_v18 = vld [vmem:[%s2114_s1 + $0x68] ss:$12 sps:$4 sm:$0xff]   ;;  %v1641_v20 = vld [vmem:[%s2114_s1 + $0x4] ss:$12 sps:$4 sm:$0xff]   ;;  %v1670_v24 = vld [vmem:[%s2114_s1 + $0x20] ss:$12 sps:$4 sm:$0xff]  }
   0x8   :  { %206 = vmatprep.subr.bf16.mxu0 %v1555_v6  ;;  %v1647_v21 = vld [vmem:[%s2114_s1 + $0x50] ss:$12 sps:$4 sm:$0xff]   ;;  %v1661_v23 = vld [vmem:[%s2114_s1 + $0x38] ss:$12 sps:$4 sm:$0xff]   ;;  %v1680_v26 = vld [vmem:[%s2114_s1 + $0x8] ss:$12 sps:$4 sm:$0xff]  }
   0x9   :  { %1216 = vmatpush3.bf16.msra.mxu1 %v1590_v12  ;;  %v60_v28 = vshrl.u32 %v59_v27, 7  ;;  %v52_v30 = vld [vmem:[%s2115_s2] sm:$0x7]  ;;  %v55_v42 = vld [vmem:[%s2116_s0 + $0x8] sm:$0xff]  ;;  %v56_v58 = vld [vmem:[%s2116_s0 + $0x10] sm:$0xff] }
   0xa   :  { %1217 = vmatprep.subr.bf16.mxu1 %v1501_v1  ;;  %v54_v33 = vld [vmem:[%s2116_s0] sm:$0xff] }
   0xb   :  { %207 = vmatpush1.bf16.msra.mxu0 %v1561_v7  ;;  %v61_v29 = vsub.s32 0, %v60_v28  ;;  %v65_v32 = vsub.s32 1, %v60_v28  ;;  %v69_v52 = vsub.s32 2, %v60_v28 }
   0xc   :  { %208 = vmatprep.subr.bf16.mxu0 %v1567_v8 }
   0xd   :  { %1218 = vmatpush3.bf16.msra.mxu1 %v1609_v15  ;;  %v1720_v31 = vrot.slane %v52_v30, %v61_v29  ;;  %v1726_v36 = vrot.slane %v52_v30, %v65_v32  ;;  %v1732_v53 = vrot.slane %v52_v30, %v69_v52  ;;  %v1099_v30 = vld [vmem:[%s2116_s0 + $0x18] sm:$0xff] }
   0xe   :  { %1219 = vmatprep.subr.bf16.mxu1 %v1501_v1 }
   0xf   :  { %209 = vmatpush1.bf16.msra.mxu0 %v1572_v9 }
  0x10   :  { %210 = vmatprep.subr.bf16.mxu0 %v1584_v11 }
  0x11   :  { %1220 = vmatpush3.bf16.msra.mxu1 %v1628_v18 }
  0x12   :  { %1221 = vmatprep.subr.bf16.mxu1 %v1501_v1 }
  0x13   :  { %211 = vmatpush1.bf16.msra.mxu0 %v1597_v13 }
  0x14   :  { %212 = vmatprep.subr.bf16.mxu0 %v1603_v14 }
  0x15   :  { %1222 = vmatpush3.bf16.msra.mxu1 %v1647_v21 }
  0x16   :  { %1223 = vmatprep.subr.bf16.mxu1 %v1501_v1 }
  0x17   :  { %213 = vmatpush1.bf16.msra.mxu0 %v1616_v16 }
  0x18   :  { %214 = vmatprep.subr.bf16.mxu0 %v1622_v17 }
  0x19   :  { %1224 = vmatpush3.bf16.msra.mxu1 %v1661_v23 }
  0x1a   :  { %1225 = vmatprep.subr.bf16.mxu1 %v1501_v1 }
  0x1b   :  { %215 = vmatpush1.bf16.msra.mxu0 %v1635_v19 }
  0x1c   :  { %216 = vmatprep.subr.bf16.mxu0 %v1641_v20 }
  0x1d   :  { %1226 = vmatpush3.bf16.msra.mxu1 %v1670_v24 }
  0x1e   :  { %1227 = vmatprep.subr.bf16.mxu1 %v1501_v1 }
  0x1f   :  { %217 = vmatpush1.bf16.msra.mxu0 %v1654_v22 }
  0x20   :  { %310 = vmatprep.subr.bf16.mxu0 %v1528_v0 }
  0x21   :  { %1228 = vmatpush3.bf16.msra.mxu1 %v1680_v26 }
  0x22   :  { %235 = vmatmul.mubr.bf16.vlgmr.msra.gmra.mxu0 %v1504_v25  ;;  %1233 = vmatprep.subr.bf16.mxu1 %v1501_v1 }
  0x23   :  { %311 = vmatpush1.bf16.msra.mxu0 %v1535_v3  ;;  %342 = vmatprep.mubr.bf16.mxu0 %v1502_v2 }
  0x24   :  { %312 = vmatprep.subr.bf16.mxu0 %v1543_v4  ;;  %1230 = vmatmul.mubr.bf16.vlgmr.msra.gmra.mxu1 %v1504_v25 }
  0x25   :  { %1234 = vmatpush3.bf16.msra.mxu1 %v1578_v10  ;;  %1249 = vmatprep.mubr.msk.bf16.mxu1 %vm1503_vm0, %v1501_v1 }
  0x26   :  { %1235 = vmatprep.subr.bf16.mxu1 %v1501_v1 }
  0x27   :  { %313 = vmatpush1.bf16.msra.mxu0 %v1549_v5 }
  0x28   :  { %314 = vmatprep.subr.bf16.mxu0 %v1555_v6 }
  0x29   :  { %1236 = vmatpush3.bf16.msra.mxu1 %v1590_v12 }
  0x2a   :  { %1237 = vmatprep.subr.bf16.mxu1 %v1501_v1 }
  0x2b   :  { %315 = vmatpush1.bf16.msra.mxu0 %v1561_v7 }
  0x2c   :  { %316 = vmatprep.subr.bf16.mxu0 %v1567_v8 }
  0x2d   :  { %1238 = vmatpush3.bf16.msra.mxu1 %v1609_v15 }
  0x2e   :  { %1239 = vmatprep.subr.bf16.mxu1 %v1501_v1 }
  0x2f   :  { %317 = vmatpush1.bf16.msra.mxu0 %v1572_v9 }
  0x30   :  { %318 = vmatprep.subr.bf16.mxu0 %v1584_v11 }
  0x31   :  { %1240 = vmatpush3.bf16.msra.mxu1 %v1628_v18 }
  0x32   :  { %1241 = vmatprep.subr.bf16.mxu1 %v1501_v1 }
  0x33   :  { %319 = vmatpush1.bf16.msra.mxu0 %v1597_v13 }
  0x34   :  { %320 = vmatprep.subr.bf16.mxu0 %v1603_v14 }
  0x35   :  { %1242 = vmatpush3.bf16.msra.mxu1 %v1647_v21 }
  0x36   :  { %1243 = vmatprep.subr.bf16.mxu1 %v1501_v1 }
  0x37   :  { %321 = vmatpush1.bf16.msra.mxu0 %v1616_v16 }
  0x38   :  { %322 = vmatprep.subr.bf16.mxu0 %v1622_v17 }
  0x39   :  { %1244 = vmatpush3.bf16.msra.mxu1 %v1661_v23 }
  0x3a   :  { %1245 = vmatprep.subr.bf16.mxu1 %v1501_v1 }
  0x3b   :  { %323 = vmatpush1.bf16.msra.mxu0 %v1635_v19 }
  0x3c   :  { %324 = vmatprep.subr.bf16.mxu0 %v1641_v20 }
  0x3d   :  { %1246 = vmatpush3.bf16.msra.mxu1 %v1670_v24 }
  0x3e   :  { %1247 = vmatprep.subr.bf16.mxu1 %v1501_v1 }
  0x3f   :  { %325 = vmatpush1.bf16.msra.mxu0 %v1654_v22 }
  0x40   :  { %419 = vmatprep.subr.bf16.mxu0 %v1528_v0 }
  0x41   :  { %1248 = vmatpush3.bf16.msra.mxu1 %v1680_v26 }
  0x42   :  { %1253 = vmatprep.subr.bf16.mxu1 %v1501_v1 }
  0xe2   :  { %v236_v34 = vpop.f32.mrf.mxu0 }
  0xe3   :  { %v237_v35 = vadd.f32 %v236_v34, %v1720_v31 }
  0xe4   :  { %v238_v37 = vpop.f32.mrf.mxu0  ;;  %v277_v45 = vpop.f32.mrf.mxu1 }
  0xe5   :  { %v283_v38 = vadd.f32 %v237_v35, %v54_v33  ;;  %v239_v41 = vadd.f32 %v238_v37, %v1726_v36  ;;  %v278_v56 = vadd.f32 %v277_v45, %v1732_v53 }
  0xe6   :  { %v240_v39 = vpop.f32.mrf.mxu0  ;;  %v1231_v46 = vpop.f32.mrf.mxu1 }
  0xe7   :  { %v1097_v40 = vmul.f32 -1.442695, %v283_v38  ;;  %v290_v44 = vadd.f32 %v239_v41, %v55_v42 }
  0xe8   :  { %v241_v43 = vpop.f32.mrf.mxu0  ;;  %v280_v48 = vpop.f32.mrf.mxu1 }
  0xe9   :  { %1409 = vpow2.f32 %v1097_v40  ;;  %v1098_v47 = vmul.f32 -1.442695, %v290_v44  ;;  %v1100_v43 = vld [vmem:[%s2116_s0 + $0x20] sm:$0xff] }
  0xea   :  { %v1232_v49 = vpop.f32.mrf.mxu1 }
  0xeb   :  { %1411 = vpow2.f32 %v1098_v47 }
  0xf6   :  { %v1410_v50 = vpop.eup %1409 }
  0xf7   :  { %v287_v51 = vadd.f32 1.0, %v1410_v50 }
  0xf8   :  { %v1412_v54 = vpop.eup %1411 }
  0xf9   :  { %1413 = vrcp.f32 %v287_v51  ;;  %v294_v55 = vadd.f32 1.0, %v1412_v54 }
  0xfb   :  { %1415 = vrcp.f32 %v294_v55  ;;  %v1101_v55 = vld [vmem:[%s2116_s0 + $0x28] sm:$0xff] }
 0x106   :  { %v1414_v57 = vpop.eup %1413 }
 0x107   :  { %v297_v59 = vmul.f32 %v1414_v57, %v278_v56 }
 0x108   :  { %v1416_v61 = vpop.eup %1415 }
 0x109   :  { %v298_v60 = vadd.f32 %v297_v59, %v56_v58  ;;  %v300_v62 = vsub.f32 1.0, %v1416_v61  ;;  %v302_v27 = vmul.f32 0.0, %v1416_v61 }
 0x10b   :  { %1417 = vtanh.f32 %v298_v60 }
 0x118   :  { %v1418_v63 = vpop.eup %1417 }
 0x119   :  { %v301_v25 = vmul.f32 %v1418_v63, %v300_v62 }
 0x11b   :  { %v1738_v28 = vadd.f32 %v302_v27, %v301_v25  ;;  %v1105_v27 = vld [vmem:[%s2116_s0 + $0x30] sm:$0xff] }
 0x11d   :  { %304 = vst [vmem:[%s2117_s3] sm:$0xff] %v1738_v28  ;;  %v309_v29 = vpack.c.bf16 %v1738_v28, %v1738_v28 }
 0x11f   :  { %343 = vmatmul.mubr.bf16.vlgmr.msra.gmra.mxu0 %v309_v29  ;;  %1250 = vmatmul.mubr.bf16.vlgmr.msra.gmra.mxu1 %v309_v29 }
 0x120   :  { %420 = vmatpush1.bf16.msra.mxu0 %v1535_v3  ;;  %1254 = vmatpush3.bf16.msra.mxu1 %v1578_v10 }
 0x121   :  { %421 = vmatprep.subr.bf16.mxu0 %v1543_v4  ;;  %1255 = vmatprep.subr.bf16.mxu1 %v1501_v1 }
 0x122   :  { %451 = vmatprep.mubr.bf16.mxu0 %v1502_v2  ;;  %1269 = vmatprep.mubr.msk.bf16.mxu1 %vm1503_vm0, %v1501_v1 }
 0x124   :  { %422 = vmatpush1.bf16.msra.mxu0 %v1549_v5  ;;  %1256 = vmatpush3.bf16.msra.mxu1 %v1590_v12 }
 0x125   :  { %423 = vmatprep.subr.bf16.mxu0 %v1555_v6  ;;  %1257 = vmatprep.subr.bf16.mxu1 %v1501_v1 }
 0x128   :  { %424 = vmatpush1.bf16.msra.mxu0 %v1561_v7  ;;  %1258 = vmatpush3.bf16.msra.mxu1 %v1609_v15 }
 0x129   :  { %425 = vmatprep.subr.bf16.mxu0 %v1567_v8  ;;  %1259 = vmatprep.subr.bf16.mxu1 %v1501_v1 }
 0x12c   :  { %426 = vmatpush1.bf16.msra.mxu0 %v1572_v9  ;;  %1260 = vmatpush3.bf16.msra.mxu1 %v1628_v18 }
 0x12d   :  { %427 = vmatprep.subr.bf16.mxu0 %v1584_v11  ;;  %1261 = vmatprep.subr.bf16.mxu1 %v1501_v1 }
 0x130   :  { %428 = vmatpush1.bf16.msra.mxu0 %v1597_v13  ;;  %1262 = vmatpush3.bf16.msra.mxu1 %v1647_v21 }
 0x131   :  { %429 = vmatprep.subr.bf16.mxu0 %v1603_v14  ;;  %1263 = vmatprep.subr.bf16.mxu1 %v1501_v1 }
 0x134   :  { %430 = vmatpush1.bf16.msra.mxu0 %v1616_v16  ;;  %1264 = vmatpush3.bf16.msra.mxu1 %v1661_v23 }
 0x135   :  { %431 = vmatprep.subr.bf16.mxu0 %v1622_v17  ;;  %1265 = vmatprep.subr.bf16.mxu1 %v1501_v1 }
 0x138   :  { %432 = vmatpush1.bf16.msra.mxu0 %v1635_v19  ;;  %1266 = vmatpush3.bf16.msra.mxu1 %v1670_v24 }
 0x139   :  { %433 = vmatprep.subr.bf16.mxu0 %v1641_v20  ;;  %1267 = vmatprep.subr.bf16.mxu1 %v1501_v1 }
 0x13c   :  { %434 = vmatpush1.bf16.msra.mxu0 %v1654_v22  ;;  %1268 = vmatpush3.bf16.msra.mxu1 %v1680_v26 }
 0x13d   :  { %528 = vmatprep.subr.bf16.mxu0 %v1528_v0  ;;  %1273 = vmatprep.subr.bf16.mxu1 %v1501_v1 }
 0x1df   :  { %v344_v32 = vpop.f32.mrf.mxu0  ;;  %v385_v33 = vpop.f32.mrf.mxu1 }
 0x1e0   :  { %v345_v34 = vadd.f32 %v344_v32, %v1720_v31  ;;  %v386_v52 = vadd.f32 %v385_v33, %v1732_v53 }
 0x1e1   :  { %v346_v35 = vpop.f32.mrf.mxu0  ;;  %v1251_v37 = vpop.f32.mrf.mxu1 }
 0x1e2   :  { %v391_v38 = vadd.f32 %v1099_v30, %v345_v34  ;;  %v347_v42 = vadd.f32 %v346_v35, %v1726_v36 }
 0x1e3   :  { %v348_v39 = vpop.f32.mrf.mxu0  ;;  %v388_v40 = vpop.f32.mrf.mxu1 }
 0x1e4   :  { %v1102_v41 = vmul.f32 -1.442695, %v391_v38  ;;  %v398_v46 = vadd.f32 %v1100_v43, %v347_v42  ;;  %v1106_v40 = vld [vmem:[%s2116_s0 + $0x38] sm:$0xff] }
 0x1e5   :  { %v349_v44 = vpop.f32.mrf.mxu0  ;;  %v1252_v45 = vpop.f32.mrf.mxu1 }
 0x1e6   :  { %1419 = vpow2.f32 %v1102_v41  ;;  %v1103_v47 = vmul.f32 -1.442695, %v398_v46 }
 0x1e8   :  { %1421 = vpow2.f32 %v1103_v47 }
 0x1f3   :  { %v1420_v48 = vpop.eup %1419 }
 0x1f4   :  { %v395_v49 = vadd.f32 1.0, %v1420_v48 }
 0x1f5   :  { %v1422_v50 = vpop.eup %1421 }
 0x1f6   :  { %1423 = vrcp.f32 %v395_v49  ;;  %v402_v51 = vadd.f32 1.0, %v1422_v50 }
 0x1f8   :  { %1425 = vrcp.f32 %v402_v51  ;;  %v1107_v51 = vld [vmem:[%s2116_s0 + $0x40] sm:$0xff] }
 0x203   :  { %v1424_v54 = vpop.eup %1423 }
 0x204   :  { %v405_v56 = vmul.f32 %v1424_v54, %v386_v52 }
 0x205   :  { %v1426_v58 = vpop.eup %1425 }
 0x206   :  { %v406_v57 = vadd.f32 %v1101_v55, %v405_v56  ;;  %v408_v59 = vsub.f32 1.0, %v1426_v58  ;;  %v410_v62 = vmul.f32 %v1426_v58, %v1738_v28 }
 0x208   :  { %1427 = vtanh.f32 %v406_v57 }
 0x215   :  { %v1428_v60 = vpop.eup %1427 }
 0x216   :  { %v409_v61 = vmul.f32 %v1428_v60, %v408_v59 }
 0x218   :  { %v1794_v63 = vadd.f32 %v410_v62, %v409_v61  ;;  %v1111_v62 = vld [vmem:[%s2116_s0 + $0x48] sm:$0xff] }
 0x21a   :  { %1104 = vst [vmem:[%s2117_s3 + $0x8] sm:$0xff] %v1794_v63  ;;  %v418_v25 = vpack.c.bf16 %v1794_v63, %v1794_v63 }
 0x21c   :  { %452 = vmatmul.mubr.bf16.vlgmr.msra.gmra.mxu0 %v418_v25  ;;  %1270 = vmatmul.mubr.bf16.vlgmr.msra.gmra.mxu1 %v418_v25 }
 0x21d   :  { %529 = vmatpush1.bf16.msra.mxu0 %v1535_v3  ;;  %1274 = vmatpush3.bf16.msra.mxu1 %v1578_v10 }
 0x21e   :  { %530 = vmatprep.subr.bf16.mxu0 %v1543_v4  ;;  %1275 = vmatprep.subr.bf16.mxu1 %v1501_v1 }
 0x21f   :  { %560 = vmatprep.mubr.bf16.mxu0 %v1502_v2  ;;  %1289 = vmatprep.mubr.msk.bf16.mxu1 %vm1503_vm0, %v1501_v1 }
 0x221   :  { %531 = vmatpush1.bf16.msra.mxu0 %v1549_v5  ;;  %1276 = vmatpush3.bf16.msra.mxu1 %v1590_v12 }
 0x222   :  { %532 = vmatprep.subr.bf16.mxu0 %v1555_v6  ;;  %1277 = vmatprep.subr.bf16.mxu1 %v1501_v1 }
 0x225   :  { %533 = vmatpush1.bf16.msra.mxu0 %v1561_v7  ;;  %1278 = vmatpush3.bf16.msra.mxu1 %v1609_v15 }
 0x226   :  { %534 = vmatprep.subr.bf16.mxu0 %v1567_v8  ;;  %1279 = vmatprep.subr.bf16.mxu1 %v1501_v1 }
 0x229   :  { %535 = vmatpush1.bf16.msra.mxu0 %v1572_v9  ;;  %1280 = vmatpush3.bf16.msra.mxu1 %v1628_v18 }
 0x22a   :  { %536 = vmatprep.subr.bf16.mxu0 %v1584_v11  ;;  %1281 = vmatprep.subr.bf16.mxu1 %v1501_v1 }
 0x22d   :  { %537 = vmatpush1.bf16.msra.mxu0 %v1597_v13  ;;  %1282 = vmatpush3.bf16.msra.mxu1 %v1647_v21 }
 0x22e   :  { %538 = vmatprep.subr.bf16.mxu0 %v1603_v14  ;;  %1283 = vmatprep.subr.bf16.mxu1 %v1501_v1 }
 0x231   :  { %539 = vmatpush1.bf16.msra.mxu0 %v1616_v16  ;;  %1284 = vmatpush3.bf16.msra.mxu1 %v1661_v23 }
 0x232   :  { %540 = vmatprep.subr.bf16.mxu0 %v1622_v17  ;;  %1285 = vmatprep.subr.bf16.mxu1 %v1501_v1 }
 0x235   :  { %541 = vmatpush1.bf16.msra.mxu0 %v1635_v19  ;;  %1286 = vmatpush3.bf16.msra.mxu1 %v1670_v24 }
 0x236   :  { %542 = vmatprep.subr.bf16.mxu0 %v1641_v20  ;;  %1287 = vmatprep.subr.bf16.mxu1 %v1501_v1 }
 0x239   :  { %543 = vmatpush1.bf16.msra.mxu0 %v1654_v22  ;;  %1288 = vmatpush3.bf16.msra.mxu1 %v1680_v26 }
 0x23a   :  { %637 = vmatprep.subr.bf16.mxu0 %v1528_v0  ;;  %1293 = vmatprep.subr.bf16.mxu1 %v1501_v1 }
 0x2dc   :  { %v453_v28 = vpop.f32.mrf.mxu0  ;;  %v494_v29 = vpop.f32.mrf.mxu1 }
 0x2dd   :  { %v454_v30 = vadd.f32 %v453_v28, %v1720_v31  ;;  %v495_v49 = vadd.f32 %v494_v29, %v1732_v53 }
 0x2de   :  { %v455_v32 = vpop.f32.mrf.mxu0  ;;  %v1271_v33 = vpop.f32.mrf.mxu1 }
 0x2df   :  { %v500_v34 = vadd.f32 %v1105_v27, %v454_v30  ;;  %v456_v39 = vadd.f32 %v455_v32, %v1726_v36 }
 0x2e0   :  { %v457_v35 = vpop.f32.mrf.mxu0  ;;  %v497_v37 = vpop.f32.mrf.mxu1 }
 0x2e1   :  { %v1108_v38 = vmul.f32 -1.442695, %v500_v34  ;;  %v507_v43 = vadd.f32 %v1106_v40, %v456_v39  ;;  %v1112_v37 = vld [vmem:[%s2116_s0 + $0x50] sm:$0xff] }
 0x2e2   :  { %v458_v41 = vpop.f32.mrf.mxu0  ;;  %v1272_v42 = vpop.f32.mrf.mxu1 }
 0x2e3   :  { %1429 = vpow2.f32 %v1108_v38  ;;  %v1109_v44 = vmul.f32 -1.442695, %v507_v43 }
 0x2e5   :  { %1431 = vpow2.f32 %v1109_v44 }
 0x2f0   :  { %v1430_v45 = vpop.eup %1429 }
 0x2f1   :  { %v504_v46 = vadd.f32 1.0, %v1430_v45 }
 0x2f2   :  { %v1432_v47 = vpop.eup %1431 }
 0x2f3   :  { %1433 = vrcp.f32 %v504_v46  ;;  %v511_v48 = vadd.f32 1.0, %v1432_v47 }
 0x2f5   :  { %1435 = vrcp.f32 %v511_v48  ;;  %v1113_v48 = vld [vmem:[%s2116_s0 + $0x58] sm:$0xff] }
 0x300   :  { %v1434_v50 = vpop.eup %1433 }
 0x301   :  { %v514_v52 = vmul.f32 %v1434_v50, %v495_v49 }
 0x302   :  { %v1436_v55 = vpop.eup %1435 }
 0x303   :  { %v515_v54 = vadd.f32 %v1107_v51, %v514_v52  ;;  %v517_v56 = vsub.f32 1.0, %v1436_v55  ;;  %v519_v59 = vmul.f32 %v1436_v55, %v1794_v63 }
 0x305   :  { %1437 = vtanh.f32 %v515_v54 }
 0x312   :  { %v1438_v57 = vpop.eup %1437 }
 0x313   :  { %v518_v58 = vmul.f32 %v1438_v57, %v517_v56 }
 0x315   :  { %v1850_v60 = vadd.f32 %v519_v59, %v518_v58  ;;  %v1117_v59 = vld [vmem:[%s2116_s0 + $0x60] sm:$0xff] }
 0x317   :  { %1110 = vst [vmem:[%s2117_s3 + $0x10] sm:$0xff] %v1850_v60  ;;  %v527_v61 = vpack.c.bf16 %v1850_v60, %v1850_v60 }
 0x319   :  { %561 = vmatmul.mubr.bf16.vlgmr.msra.gmra.mxu0 %v527_v61  ;;  %1290 = vmatmul.mubr.bf16.vlgmr.msra.gmra.mxu1 %v527_v61 }
 0x31a   :  { %638 = vmatpush1.bf16.msra.mxu0 %v1535_v3  ;;  %1294 = vmatpush3.bf16.msra.mxu1 %v1578_v10 }
 0x31b   :  { %639 = vmatprep.subr.bf16.mxu0 %v1543_v4  ;;  %1295 = vmatprep.subr.bf16.mxu1 %v1501_v1 }
 0x31c   :  { %669 = vmatprep.mubr.bf16.mxu0 %v1502_v2  ;;  %1309 = vmatprep.mubr.msk.bf16.mxu1 %vm1503_vm0, %v1501_v1 }
 0x31e   :  { %640 = vmatpush1.bf16.msra.mxu0 %v1549_v5  ;;  %1296 = vmatpush3.bf16.msra.mxu1 %v1590_v12 }
 0x31f   :  { %641 = vmatprep.subr.bf16.mxu0 %v1555_v6  ;;  %1297 = vmatprep.subr.bf16.mxu1 %v1501_v1 }
 0x322   :  { %642 = vmatpush1.bf16.msra.mxu0 %v1561_v7  ;;  %1298 = vmatpush3.bf16.msra.mxu1 %v1609_v15 }
 0x323   :  { %643 = vmatprep.subr.bf16.mxu0 %v1567_v8  ;;  %1299 = vmatprep.subr.bf16.mxu1 %v1501_v1 }
 0x326   :  { %644 = vmatpush1.bf16.msra.mxu0 %v1572_v9  ;;  %1300 = vmatpush3.bf16.msra.mxu1 %v1628_v18 }
 0x327   :  { %645 = vmatprep.subr.bf16.mxu0 %v1584_v11  ;;  %1301 = vmatprep.subr.bf16.mxu1 %v1501_v1 }
 0x32a   :  { %646 = vmatpush1.bf16.msra.mxu0 %v1597_v13  ;;  %1302 = vmatpush3.bf16.msra.mxu1 %v1647_v21 }
 0x32b   :  { %647 = vmatprep.subr.bf16.mxu0 %v1603_v14  ;;  %1303 = vmatprep.subr.bf16.mxu1 %v1501_v1 }
 0x32e   :  { %648 = vmatpush1.bf16.msra.mxu0 %v1616_v16  ;;  %1304 = vmatpush3.bf16.msra.mxu1 %v1661_v23 }
 0x32f   :  { %649 = vmatprep.subr.bf16.mxu0 %v1622_v17  ;;  %1305 = vmatprep.subr.bf16.mxu1 %v1501_v1 }
 0x332   :  { %650 = vmatpush1.bf16.msra.mxu0 %v1635_v19  ;;  %1306 = vmatpush3.bf16.msra.mxu1 %v1670_v24 }
 0x333   :  { %651 = vmatprep.subr.bf16.mxu0 %v1641_v20  ;;  %1307 = vmatprep.subr.bf16.mxu1 %v1501_v1 }
 0x336   :  { %652 = vmatpush1.bf16.msra.mxu0 %v1654_v22  ;;  %1308 = vmatpush3.bf16.msra.mxu1 %v1680_v26 }
 0x337   :  { %746 = vmatprep.subr.bf16.mxu0 %v1528_v0  ;;  %1313 = vmatprep.subr.bf16.mxu1 %v1501_v1 }
 0x3d9   :  { %v562_v63 = vpop.f32.mrf.mxu0  ;;  %v603_v25 = vpop.f32.mrf.mxu1 }
 0x3da   :  { %v563_v27 = vadd.f32 %v562_v63, %v1720_v31  ;;  %v604_v46 = vadd.f32 %v603_v25, %v1732_v53 }
 0x3db   :  { %v564_v28 = vpop.f32.mrf.mxu0  ;;  %v1291_v29 = vpop.f32.mrf.mxu1 }
 0x3dc   :  { %v609_v30 = vadd.f32 %v1111_v62, %v563_v27  ;;  %v565_v35 = vadd.f32 %v564_v28, %v1726_v36 }
 0x3dd   :  { %v566_v32 = vpop.f32.mrf.mxu0  ;;  %v606_v33 = vpop.f32.mrf.mxu1 }
 0x3de   :  { %v1114_v34 = vmul.f32 -1.442695, %v609_v30  ;;  %v616_v40 = vadd.f32 %v1112_v37, %v565_v35  ;;  %v1118_v33 = vld [vmem:[%s2116_s0 + $0x68] sm:$0xff] }
 0x3df   :  { %v567_v38 = vpop.f32.mrf.mxu0  ;;  %v1292_v39 = vpop.f32.mrf.mxu1 }
 0x3e0   :  { %1439 = vpow2.f32 %v1114_v34  ;;  %v1115_v41 = vmul.f32 -1.442695, %v616_v40 }
 0x3e2   :  { %1441 = vpow2.f32 %v1115_v41 }
 0x3ed   :  { %v1440_v42 = vpop.eup %1439 }
 0x3ee   :  { %v613_v43 = vadd.f32 1.0, %v1440_v42 }
 0x3ef   :  { %v1442_v44 = vpop.eup %1441 }
 0x3f0   :  { %1443 = vrcp.f32 %v613_v43  ;;  %v620_v45 = vadd.f32 1.0, %v1442_v44 }
 0x3f2   :  { %1445 = vrcp.f32 %v620_v45  ;;  %v1119_v45 = vld [vmem:[%s2116_s0 + $0x70] sm:$0xff] }
 0x3fd   :  { %v1444_v47 = vpop.eup %1443 }
 0x3fe   :  { %v623_v49 = vmul.f32 %v1444_v47, %v604_v46 }
 0x3ff   :  { %v1446_v51 = vpop.eup %1445 }
 0x400   :  { %v624_v50 = vadd.f32 %v1113_v48, %v623_v49  ;;  %v626_v52 = vsub.f32 1.0, %v1446_v51  ;;  %v628_v56 = vmul.f32 %v1446_v51, %v1850_v60 }
 0x402   :  { %1447 = vtanh.f32 %v624_v50 }
 0x40f   :  { %v1448_v54 = vpop.eup %1447 }
 0x410   :  { %v627_v55 = vmul.f32 %v1448_v54, %v626_v52 }
 0x412   :  { %v1906_v57 = vadd.f32 %v628_v56, %v627_v55 }
 0x414   :  { %1116 = vst [vmem:[%s2117_s3 + $0x18] sm:$0xff] %v1906_v57  ;;  %v636_v58 = vpack.c.bf16 %v1906_v57, %v1906_v57 }
 0x416   :  { %670 = vmatmul.mubr.bf16.vlgmr.msra.gmra.mxu0 %v636_v58  ;;  %1310 = vmatmul.mubr.bf16.vlgmr.msra.gmra.mxu1 %v636_v58 }
 0x417   :  { %747 = vmatpush1.bf16.msra.mxu0 %v1535_v3  ;;  %1314 = vmatpush3.bf16.msra.mxu1 %v1578_v10 }
 0x418   :  { %748 = vmatprep.subr.bf16.mxu0 %v1543_v4  ;;  %1315 = vmatprep.subr.bf16.mxu1 %v1501_v1 }
 0x419   :  { %778 = vmatprep.mubr.bf16.mxu0 %v1502_v2  ;;  %1329 = vmatprep.mubr.msk.bf16.mxu1 %vm1503_vm0, %v1501_v1 }
 0x41b   :  { %749 = vmatpush1.bf16.msra.mxu0 %v1549_v5  ;;  %1316 = vmatpush3.bf16.msra.mxu1 %v1590_v12 }
 0x41c   :  { %750 = vmatprep.subr.bf16.mxu0 %v1555_v6  ;;  %1317 = vmatprep.subr.bf16.mxu1 %v1501_v1 }
 0x41f   :  { %751 = vmatpush1.bf16.msra.mxu0 %v1561_v7  ;;  %1318 = vmatpush3.bf16.msra.mxu1 %v1609_v15 }
 0x420   :  { %752 = vmatprep.subr.bf16.mxu0 %v1567_v8  ;;  %1319 = vmatprep.subr.bf16.mxu1 %v1501_v1 }
 0x423   :  { %753 = vmatpush1.bf16.msra.mxu0 %v1572_v9  ;;  %1320 = vmatpush3.bf16.msra.mxu1 %v1628_v18 }
 0x424   :  { %754 = vmatprep.subr.bf16.mxu0 %v1584_v11  ;;  %1321 = vmatprep.subr.bf16.mxu1 %v1501_v1 }
 0x427   :  { %755 = vmatpush1.bf16.msra.mxu0 %v1597_v13  ;;  %1322 = vmatpush3.bf16.msra.mxu1 %v1647_v21 }
 0x428   :  { %756 = vmatprep.subr.bf16.mxu0 %v1603_v14  ;;  %1323 = vmatprep.subr.bf16.mxu1 %v1501_v1 }
 0x42b   :  { %757 = vmatpush1.bf16.msra.mxu0 %v1616_v16  ;;  %1324 = vmatpush3.bf16.msra.mxu1 %v1661_v23 }
 0x42c   :  { %758 = vmatprep.subr.bf16.mxu0 %v1622_v17  ;;  %1325 = vmatprep.subr.bf16.mxu1 %v1501_v1 }
 0x42f   :  { %759 = vmatpush1.bf16.msra.mxu0 %v1635_v19  ;;  %1326 = vmatpush3.bf16.msra.mxu1 %v1670_v24 }
 0x430   :  { %760 = vmatprep.subr.bf16.mxu0 %v1641_v20  ;;  %1327 = vmatprep.subr.bf16.mxu1 %v1501_v1 }
 0x433   :  { %761 = vmatpush1.bf16.msra.mxu0 %v1654_v22  ;;  %1328 = vmatpush3.bf16.msra.mxu1 %v1680_v26 }
 0x434   :  { %855 = vmatprep.subr.bf16.mxu0 %v1528_v0  ;;  %1333 = vmatprep.subr.bf16.mxu1 %v1501_v1 }
 0x4d6   :  { %v671_v60 = vpop.f32.mrf.mxu0  ;;  %v712_v61 = vpop.f32.mrf.mxu1 }
 0x4d7   :  { %v672_v62 = vadd.f32 %v671_v60, %v1720_v31  ;;  %v713_v43 = vadd.f32 %v712_v61, %v1732_v53 }
 0x4d8   :  { %v673_v63 = vpop.f32.mrf.mxu0  ;;  %v1311_v25 = vpop.f32.mrf.mxu1 }
 0x4d9   :  { %v718_v27 = vadd.f32 %v1117_v59, %v672_v62  ;;  %v674_v32 = vadd.f32 %v673_v63, %v1726_v36 }
 0x4da   :  { %v675_v28 = vpop.f32.mrf.mxu0  ;;  %v715_v29 = vpop.f32.mrf.mxu1 }
 0x4db   :  { %v1120_v30 = vmul.f32 -1.442695, %v718_v27  ;;  %v725_v37 = vadd.f32 %v1118_v33, %v674_v32  ;;  %v1125_v27 = vld [vmem:[%s2116_s0 + $0x88] sm:$0xff] }
 0x4dc   :  { %v676_v34 = vpop.f32.mrf.mxu0  ;;  %v1312_v35 = vpop.f32.mrf.mxu1 }
 0x4dd   :  { %1449 = vpow2.f32 %v1120_v30  ;;  %v1121_v38 = vmul.f32 -1.442695, %v725_v37 }
 0x4df   :  { %1451 = vpow2.f32 %v1121_v38 }
 0x4ea   :  { %v1450_v39 = vpop.eup %1449 }
 0x4eb   :  { %v722_v40 = vadd.f32 1.0, %v1450_v39  ;;  %v1489_v39 = vld [vmem:[%s2114_s1 + $0xa8] ss:$12 sps:$4 sm:$0xff]  }
 0x4ec   :  { %v1452_v41 = vpop.eup %1451 }
 0x4ed   :  { %1453 = vrcp.f32 %v722_v40  ;;  %v729_v42 = vadd.f32 1.0, %v1452_v41  ;;  %v1490_v40 = vld [vmem:[%s2114_s1 + $0xb0] ss:$12 sps:$4 sm:$0xff]   ;;  %v1491_v41 = vld [vmem:[%s2114_s1 + $0x94] ss:$12 sps:$4 sm:$0xff]  }
 0x4ef   :  { %1455 = vrcp.f32 %v729_v42  ;;  %v1492_v42 = vld [vmem:[%s2114_s1 + $0x90] ss:$12 sps:$4 sm:$0xff]  }
 0x4fa   :  { %v1454_v44 = vpop.eup %1453 }
 0x4fb   :  { %v732_v46 = vmul.f32 %v1454_v44, %v713_v43  ;;  %v1493_v43 = vld [vmem:[%s2114_s1 + $0x98] ss:$12 sps:$4 sm:$0xff]   ;;  %v1494_v44 = vld [vmem:[%s2114_s1 + $0x7c] ss:$12 sps:$4 sm:$0xff]  }
 0x4fc   :  { %v1456_v48 = vpop.eup %1455 }
 0x4fd   :  { %v733_v47 = vadd.f32 %v1119_v45, %v732_v46  ;;  %v735_v49 = vsub.f32 1.0, %v1456_v48  ;;  %v737_v52 = vmul.f32 %v1456_v48, %v1906_v57  ;;  %v1496_v45 = vld [vmem:[%s2114_s1 + $0x64] ss:$12 sps:$4 sm:$0xff]   ;;  %v1497_v46 = vld [vmem:[%s2114_s1 + $0x60] ss:$12 sps:$4 sm:$0xff]  }
 0x4fe   :  { %v1500_v48 = vld [vmem:[%s2114_s1 + $0x34] ss:$12 sps:$4 sm:$0xff]  }
 0x4ff   :  { %1457 = vtanh.f32 %v733_v47  ;;  %v1498_v47 = vld [vmem:[%s2114_s1 + $0x4c] ss:$12 sps:$4 sm:$0xff]  }
 0x50c   :  { %v1458_v50 = vpop.eup %1457 }
 0x50d   :  { %v736_v51 = vmul.f32 %v1458_v50, %v735_v49 }
 0x50f   :  { %v1962_v54 = vadd.f32 %v737_v52, %v736_v51 }
 0x511   :  { %1122 = vst [vmem:[%s2117_s3 + $0x20] sm:$0xff] %v1962_v54  ;;  %v745_v55 = vpack.c.bf16 %v1962_v54, %v1962_v54 }
 0x513   :  { %779 = vmatmul.mubr.bf16.vlgmr.msra.gmra.mxu0 %v745_v55  ;;  %1330 = vmatmul.mubr.bf16.vlgmr.msra.gmra.mxu1 %v745_v55 }
 0x514   :  { %856 = vmatpush1.bf16.msra.mxu0 %v1535_v3  ;;  %1334 = vmatpush3.bf16.msra.mxu1 %v1578_v10  ;;  %v1123_v3 = vld [vmem:[%s2116_s0 + $0x78] sm:$0xff] }
 0x515   :  { %857 = vmatprep.subr.bf16.mxu0 %v1543_v4  ;;  %1335 = vmatprep.subr.bf16.mxu1 %v1501_v1 }
 0x516   :  { %887 = vmatprep.mubr.bf16.mxu0 %v1502_v2  ;;  %1349 = vmatprep.mubr.msk.bf16.mxu1 %vm1503_vm0, %v1501_v1 }
 0x518   :  { %858 = vmatpush1.bf16.msra.mxu0 %v1549_v5  ;;  %1336 = vmatpush3.bf16.msra.mxu1 %v1590_v12 }
 0x519   :  { %859 = vmatprep.subr.bf16.mxu0 %v1555_v6  ;;  %1337 = vmatprep.subr.bf16.mxu1 %v1501_v1 }
 0x51c   :  { %860 = vmatpush1.bf16.msra.mxu0 %v1561_v7  ;;  %1338 = vmatpush3.bf16.msra.mxu1 %v1609_v15 }
 0x51d   :  { %861 = vmatprep.subr.bf16.mxu0 %v1567_v8  ;;  %1339 = vmatprep.subr.bf16.mxu1 %v1501_v1 }
 0x520   :  { %862 = vmatpush1.bf16.msra.mxu0 %v1572_v9  ;;  %1340 = vmatpush3.bf16.msra.mxu1 %v1628_v18 }
 0x521   :  { %863 = vmatprep.subr.bf16.mxu0 %v1584_v11  ;;  %1341 = vmatprep.subr.bf16.mxu1 %v1501_v1 }
 0x524   :  { %864 = vmatpush1.bf16.msra.mxu0 %v1597_v13  ;;  %1342 = vmatpush3.bf16.msra.mxu1 %v1647_v21 }
 0x525   :  { %865 = vmatprep.subr.bf16.mxu0 %v1603_v14  ;;  %1343 = vmatprep.subr.bf16.mxu1 %v1501_v1 }
 0x528   :  { %866 = vmatpush1.bf16.msra.mxu0 %v1616_v16  ;;  %1344 = vmatpush3.bf16.msra.mxu1 %v1661_v23 }
 0x529   :  { %867 = vmatprep.subr.bf16.mxu0 %v1622_v17  ;;  %1345 = vmatprep.subr.bf16.mxu1 %v1501_v1 }
 0x52c   :  { %868 = vmatpush1.bf16.msra.mxu0 %v1635_v19  ;;  %1346 = vmatpush3.bf16.msra.mxu1 %v1670_v24 }
 0x52d   :  { %869 = vmatprep.subr.bf16.mxu0 %v1641_v20  ;;  %1347 = vmatprep.subr.bf16.mxu1 %v1501_v1 }
 0x530   :  { %870 = vmatpush1.bf16.msra.mxu0 %v1654_v22  ;;  %1348 = vmatpush3.bf16.msra.mxu1 %v1680_v26 }
 0x531   :  { %964 = vmatprep.subr.bf16.mxu0 %v1528_v0  ;;  %1353 = vmatprep.subr.bf16.mxu1 %v1501_v1  ;;  %v1124_v0 = vld [vmem:[%s2116_s0 + $0x80] sm:$0xff] }
 0x5d3   :  { %v780_v4 = vpop.f32.mrf.mxu0  ;;  %v821_v5 = vpop.f32.mrf.mxu1 }
 0x5d4   :  { %v781_v6 = vadd.f32 %v780_v4, %v1720_v31  ;;  %v822_v63 = vadd.f32 %v821_v5, %v1732_v53 }
 0x5d5   :  { %v782_v7 = vpop.f32.mrf.mxu0  ;;  %v1331_v8 = vpop.f32.mrf.mxu1 }
 0x5d6   :  { %v827_v9 = vadd.f32 %v1123_v3, %v781_v6  ;;  %v783_v13 = vadd.f32 %v782_v7, %v1726_v36  ;;  %v1131_v8 = vld [vmem:[%s2116_s0 + $0xa0] sm:$0xff] }
 0x5d7   :  { %v784_v10 = vpop.f32.mrf.mxu0  ;;  %v824_v11 = vpop.f32.mrf.mxu1 }
 0x5d8   :  { %v1126_v12 = vmul.f32 -1.442695, %v827_v9  ;;  %v834_v57 = vadd.f32 %v1124_v0, %v783_v13 }
 0x5d9   :  { %v785_v14 = vpop.f32.mrf.mxu0  ;;  %v1332_v56 = vpop.f32.mrf.mxu1 }
 0x5da   :  { %1459 = vpow2.f32 %v1126_v12  ;;  %v1127_v58 = vmul.f32 -1.442695, %v834_v57 }
 0x5dc   :  { %1461 = vpow2.f32 %v1127_v58  ;;  %v1135_v58 = vld [vmem:[%s2116_s0 + $0xa8] sm:$0xff] }
 0x5e7   :  { %v1460_v59 = vpop.eup %1459 }
 0x5e8   :  { %v831_v60 = vadd.f32 1.0, %v1460_v59 }
 0x5e9   :  { %v1462_v61 = vpop.eup %1461 }
 0x5ea   :  { %1463 = vrcp.f32 %v831_v60  ;;  %v838_v62 = vadd.f32 1.0, %v1462_v61 }
 0x5ec   :  { %1465 = vrcp.f32 %v838_v62 }
 0x5f7   :  { %v1464_v25 = vpop.eup %1463 }
 0x5f8   :  { %v841_v28 = vmul.f32 %v1464_v25, %v822_v63 }
 0x5f9   :  { %v1466_v30 = vpop.eup %1465 }
 0x5fa   :  { %v842_v29 = vadd.f32 %v1125_v27, %v841_v28  ;;  %v844_v32 = vsub.f32 1.0, %v1466_v30  ;;  %v846_v35 = vmul.f32 %v1466_v30, %v1962_v54 }
 0x5fc   :  { %1467 = vtanh.f32 %v842_v29 }
 0x609   :  { %v1468_v33 = vpop.eup %1467 }
 0x60a   :  { %v845_v34 = vmul.f32 %v1468_v33, %v844_v32  ;;  %v1136_v32 = vld [vmem:[%s2116_s0 + $0xb0] sm:$0xff] }
 0x60c   :  { %v2018_v37 = vadd.f32 %v846_v35, %v845_v34 }
 0x60e   :  { %1128 = vst [vmem:[%s2117_s3 + $0x28] sm:$0xff] %v2018_v37  ;;  %v854_v38 = vpack.c.bf16 %v2018_v37, %v2018_v37 }
 0x610   :  { %888 = vmatmul.mubr.bf16.vlgmr.msra.gmra.mxu0 %v854_v38  ;;  %1350 = vmatmul.mubr.bf16.vlgmr.msra.gmra.mxu1 %v854_v38 }
 0x611   :  { %965 = vmatpush1.bf16.msra.mxu0 %v1489_v39  ;;  %1354 = vmatpush3.bf16.msra.mxu1 %v1490_v40 }
 0x612   :  { %966 = vmatprep.subr.bf16.mxu0 %v1491_v41  ;;  %1355 = vmatprep.subr.bf16.mxu1 %v1501_v1 }
 0x613   :  { %996 = vmatprep.mubr.bf16.mxu0 %v1502_v2  ;;  %1369 = vmatprep.mubr.msk.bf16.mxu1 %vm1503_vm0, %v1501_v1  ;;  %v1495_v2 = vld [vmem:[%s2114_s1 + $0x78] ss:$12 sps:$4 sm:$0xff]  }
 0x615   :  { %967 = vmatpush1.bf16.msra.mxu0 %v1492_v42  ;;  %1356 = vmatpush3.bf16.msra.mxu1 %v1493_v43 }
 0x616   :  { %968 = vmatprep.subr.bf16.mxu0 %v1494_v44  ;;  %1357 = vmatprep.subr.bf16.mxu1 %v1501_v1 }
 0x619   :  { %969 = vmatpush1.bf16.msra.mxu0 %v1495_v2  ;;  %1358 = vmatpush3.bf16.msra.mxu1 %v1609_v15  ;;  %v1499_v15 = vld [vmem:[%s2114_s1 + $0x48] ss:$12 sps:$4 sm:$0xff]  }
 0x61a   :  { %970 = vmatprep.subr.bf16.mxu0 %v1496_v45  ;;  %1359 = vmatprep.subr.bf16.mxu1 %v1501_v1 }
 0x61d   :  { %971 = vmatpush1.bf16.msra.mxu0 %v1497_v46  ;;  %1360 = vmatpush3.bf16.msra.mxu1 %v1628_v18 }
 0x61e   :  { %972 = vmatprep.subr.bf16.mxu0 %v1498_v47  ;;  %1361 = vmatprep.subr.bf16.mxu1 %v1501_v1 }
 0x621   :  { %973 = vmatpush1.bf16.msra.mxu0 %v1499_v15  ;;  %1362 = vmatpush3.bf16.msra.mxu1 %v1647_v21 }
 0x622   :  { %974 = vmatprep.subr.bf16.mxu0 %v1500_v48  ;;  %1363 = vmatprep.subr.bf16.mxu1 %v1501_v1 }
 0x625   :  { %975 = vmatpush1.bf16.msra.mxu0 %v1616_v16  ;;  %1364 = vmatpush3.bf16.msra.mxu1 %v1661_v23  ;;  %v1129_v16 = vld [vmem:[%s2116_s0 + $0x90] sm:$0xff] }
 0x626   :  { %976 = vmatprep.subr.bf16.mxu0 %v1622_v17  ;;  %1365 = vmatprep.subr.bf16.mxu1 %v1501_v1 }
 0x629   :  { %977 = vmatpush1.bf16.msra.mxu0 %v1635_v19  ;;  %1366 = vmatpush3.bf16.msra.mxu1 %v1670_v24 }
 0x62a   :  { %978 = vmatprep.subr.bf16.mxu0 %v1641_v20  ;;  %1367 = vmatprep.subr.bf16.mxu1 %v1501_v1 }
 0x62d   :  { %979 = vmatpush1.bf16.msra.mxu0 %v1654_v22  ;;  %1368 = vmatpush3.bf16.msra.mxu1 %v1680_v26  ;;  %v1130_v22 = vld [vmem:[%s2116_s0 + $0x98] sm:$0xff] }
 0x6d0   :  { %v889_v18 = vpop.f32.mrf.mxu0  ;;  %v930_v17 = vpop.f32.mrf.mxu1 }
 0x6d1   :  { %v890_v21 = vadd.f32 %v889_v18, %v1720_v31  ;;  %v931_v6 = vadd.f32 %v930_v17, %v1732_v53 }
 0x6d2   :  { %v891_v23 = vpop.f32.mrf.mxu0  ;;  %v1351_v19 = vpop.f32.mrf.mxu1 }
 0x6d3   :  { %v936_v49 = vadd.f32 %v1129_v16, %v890_v21  ;;  %v892_v1 = vadd.f32 %v891_v23, %v1726_v36 }
 0x6d4   :  { %v893_v24 = vpop.f32.mrf.mxu0  ;;  %v933_v50 = vpop.f32.mrf.mxu1 }
 0x6d5   :  { %v1132_v20 = vmul.f32 -1.442695, %v936_v49  ;;  %v943_v52 = vadd.f32 %v1130_v22, %v892_v1 }
 0x6d6   :  { %v894_v26 = vpop.f32.mrf.mxu0  ;;  %v1352_v51 = vpop.f32.mrf.mxu1 }
 0x6d7   :  { %1469 = vpow2.f32 %v1132_v20  ;;  %v1133_v54 = vmul.f32 -1.442695, %v943_v52 }
 0x6d9   :  { %1471 = vpow2.f32 %v1133_v54 }
 0x6e4   :  { %v1470_v55 = vpop.eup %1469 }
 0x6e5   :  { %v940_v3 = vadd.f32 1.0, %v1470_v55 }
 0x6e6   :  { %v1472_v4 = vpop.eup %1471 }
 0x6e7   :  { %1473 = vrcp.f32 %v940_v3  ;;  %v947_v5 = vadd.f32 1.0, %v1472_v4 }
 0x6e9   :  { %1475 = vrcp.f32 %v947_v5 }
 0x6f4   :  { %v1474_v7 = vpop.eup %1473 }
 0x6f5   :  { %v950_v9 = vmul.f32 %v1474_v7, %v931_v6 }
 0x6f6   :  { %v1476_v11 = vpop.eup %1475 }
 0x6f7   :  { %v951_v10 = vadd.f32 %v1131_v8, %v950_v9  ;;  %v953_v12 = vsub.f32 1.0, %v1476_v11  ;;  %v955_v14 = vmul.f32 %v1476_v11, %v2018_v37 }
 0x6f9   :  { %1477 = vtanh.f32 %v951_v10 }
 0x706   :  { %v1478_v13 = vpop.eup %1477 }
 0x707   :  { %v954_v0 = vmul.f32 %v1478_v13, %v953_v12 }
 0x709   :  { %v956_v56 = vadd.f32 %v955_v14, %v954_v0 }
 0x70b   :  { %1134 = vst [vmem:[%s2117_s3 + $0x30] sm:$0xff] %v956_v56  ;;  %v963_v57 = vpack.c.bf16 %v956_v56, %v956_v56 }
 0x70d   :  { %997 = vmatmul.mubr.bf16.vlgmr.msra.gmra.mxu0 %v963_v57  ;;  %1370 = vmatmul.mubr.bf16.vlgmr.msra.gmra.mxu1 %v963_v57 }
 0x7cd   :  { %v998_v59 = vpop.f32.mrf.mxu0  ;;  %v1039_v60 = vpop.f32.mrf.mxu1 }
 0x7ce   :  { %v999_v61 = vadd.f32 %v998_v59, %v1720_v31  ;;  %v1040_v41 = vadd.f32 %v1039_v60, %v1732_v53 }
 0x7cf   :  { %v1000_v62 = vpop.f32.mrf.mxu0  ;;  %v1371_v63 = vpop.f32.mrf.mxu1 }
 0x7d0   :  { %v1045_v25 = vadd.f32 %v1135_v58, %v999_v61  ;;  %v1001_v30 = vadd.f32 %v1000_v62, %v1726_v36  ;;  %v1137_v36 = vld [vmem:[%s2116_s0 + $0xb8] sm:$0xff] }
 0x7d1   :  { %v1002_v27 = vpop.f32.mrf.mxu0  ;;  %v1042_v28 = vpop.f32.mrf.mxu1 }
 0x7d2   :  { %v1138_v29 = vmul.f32 -1.442695, %v1045_v25  ;;  %v1052_v35 = vadd.f32 %v1136_v32, %v1001_v30 }
 0x7d3   :  { %v1003_v33 = vpop.f32.mrf.mxu0  ;;  %v1372_v34 = vpop.f32.mrf.mxu1 }
 0x7d4   :  { %1479 = vpow2.f32 %v1138_v29  ;;  %v1139_v37 = vmul.f32 -1.442695, %v1052_v35 }
 0x7d6   :  { %1481 = vpow2.f32 %v1139_v37 }
 0x7e1   :  { %v1480_v38 = vpop.eup %1479 }
 0x7e2   :  { %v1049_v31 = vadd.f32 1.0, %v1480_v38 }
 0x7e3   :  { %v1482_v39 = vpop.eup %1481 }
 0x7e4   :  { %1483 = vrcp.f32 %v1049_v31  ;;  %v1056_v40 = vadd.f32 1.0, %v1482_v39 }
 0x7e6   :  { %1485 = vrcp.f32 %v1056_v40 }
 0x7f1   :  { %v1484_v42 = vpop.eup %1483 }
 0x7f2   :  { %v1059_v43 = vmul.f32 %v1484_v42, %v1040_v41 }
 0x7f3   :  { %v1486_v2 = vpop.eup %1485 }
 0x7f4   :  { %v1060_v44 = vadd.f32 %v1137_v36, %v1059_v43  ;;  %v1062_v45 = vsub.f32 1.0, %v1486_v2  ;;  %v1064_v15 = vmul.f32 %v1486_v2, %v956_v56 }
 0x7f6   :  { %1487 = vtanh.f32 %v1060_v44 }
 0x803   :  { %v1488_v46 = vpop.eup %1487 }
 0x804   :  { %v1063_v47 = vmul.f32 %v1488_v46, %v1062_v45 }
 0x806   :  { %v1065_v48 = vadd.f32 %v1064_v15, %v1063_v47 }
 0x808   :  { %1140 = vst [vmem:[%s2117_s3 + $0x38] sm:$0xff] %v1065_v48 }

</bundles_post_ra>
